<compile_context>
chip_gen: v7x
topology: tpu7x:2x2x1
jax: 0.10.0
libtpu: 0.0.40
codegen_flags: <defaults>
</compile_context>

<pallas_src>
import functools

import jax
import jax.numpy as jnp
from jax.experimental import pallas as pl
from jax.experimental.pallas import tpu as pltpu

# ----------------------------- configuration --------------------------------
B = 200                          # example batch (padded to tile multiple inside)
N_FEATURES = 4                   # number of sparse features
EMBED_DIM = 8                    # embed_dim per feature
D = N_FEATURES * EMBED_DIM       # self.dims = sum(embed_dims) = 32
VOCAB = 50                       # vocab size per feature (synthetic)
VOCAB_PAD = ((VOCAB + 7) // 8) * 8   # sublane-aligned vocab for in-kernel one-hot
NUM_DOMAINS = 3
N_CROSS_LAYERS = 2
MLP_DIMS = (16, 8)               # mlp_params['dims']
H1, H2 = MLP_DIMS
LR_IN = D + H2                   # input dim of LR head

# Batch tile target.  Sweep 1024-8192.  Live footprint is ~1-2 KiB / batch elem,
# so stay under ~8K on v5e (16 MiB scoped VMEM default) / ~16K on v6e / ~16-32K
# on v7x (64 MiB VMEM), or raise pltpu.CompilerParams(vmem_limit_bytes=...).
TARGET_TILE_B = 2048

# Full-f32 MXU passes: keeps the one-hot gather exact and the MLP matmuls at
# f32 accuracy (the gather/MLP mats are tiny, so the extra passes are free).
MXU_PRECISION = jax.lax.Precision.HIGHEST


# ------------------------------- kernel -------------------------------------
def dcn_md_kernel(n_valid, feat_ref, dom_ref, tab_ref, w1s_ref, c1_ref,
                  wct_ref, bct_ref, w2t_ref, c2_ref, wcn_ref, wml_ref,
                  blr_ref, out_ref):
    # Feature-major layout: features/hidden on sublanes, batch tile on lanes.
    tile_b = out_ref.shape[1]

    # ---- fused embedding gather: one-hot(idx) @ table^T on the idle MXU ------
    vocab_iota = jax.lax.broadcasted_iota(jnp.int32, (VOCAB_PAD, tile_b), 0)
    embs = []
    for f in range(N_FEATURES):                                 # static unroll (4)
        ids = feat_ref[f:f + 1, :]                              # (1, tile_b) int32
        onehot = (vocab_iota == ids).astype(jnp.float32)        # (VOCAB_PAD, tile_b)
        tab_f = tab_ref[f * EMBED_DIM:(f + 1) * EMBED_DIM, :]   # (EMBED_DIM, VOCAB_PAD)
        embs.append(jnp.dot(tab_f, onehot,
                            preferred_element_type=jnp.float32,
                            precision=MXU_PRECISION))           # (EMBED_DIM, tile_b)
    x0 = jnp.concatenate(embs, axis=0)                          # (D, tile_b)

    # ---- MLP layer 1 (BN(eval)+bias folded) with cross-layer-0 weight as an
    #      extra row of the same MXU matmul --------------------------------------
    h_all = jnp.dot(w1s_ref[...], x0, preferred_element_type=jnp.float32,
                    precision=MXU_PRECISION)                    # (H1+1, tile_b)
    h = jnp.maximum(h_all[:H1, :] + c1_ref[...], 0.0)           # (H1, tile_b)

    # ---- CrossNetwork: x_{l+1} = x0 * (w_l . x_l) + b_l + x_l (lane-dense VPU) --
    xw = h_all[H1:H1 + 1, :]                                    # (1, tile_b) = w0 . x0
    x = x0 * xw + bct_ref[:, 0:1] + x0
    for l in range(1, N_CROSS_LAYERS):
        xw = jnp.sum(x * wct_ref[:, l:l + 1], axis=0, keepdims=True)   # XLU reduce
        x = x0 * xw + bct_ref[:, l:l + 1] + x
    cn_out = x                                                  # (D, tile_b)

    # ---- MLP layer 2 ----------------------------------------------------------
    h = jnp.dot(w2t_ref[...], h, preferred_element_type=jnp.float32,
                precision=MXU_PRECISION) + c2_ref[...]
    mlp_out = jnp.maximum(h, 0.0)                               # (H2, tile_b)

    # ---- LR head on concat([cn_out, mlp_out]): VPU mul + sublane reduce --------
    y = (jnp.sum(cn_out * wcn_ref[...], axis=0, keepdims=True)
         + jnp.sum(mlp_out * wml_ref[...], axis=0, keepdims=True)
         + blr_ref[0, 0])                                       # (1, tile_b)
    prob = jax.nn.sigmoid(y)

    # ---- in-kernel padding mask + per-domain masked select (prob is identical
    #      across domains, as in the reference) ---------------------------------
    col = pl.program_id(0) * tile_b + jax.lax.broadcasted_iota(
        jnp.int32, (1, tile_b), 1)
    dom = dom_ref[...]                                          # (1, tile_b) int32
    valid = (col < n_valid) & (dom >= 0) & (dom < NUM_DOMAINS)
    out_ref[...] = jnp.where(valid, prob, 0.0)


# ------------------------------ wrapper --------------------------------------
def dcn_md_forward(feat_idx, domain_id, kparams, tile_b=None):
    """feat_idx: (N_FEATURES, B) int32, domain_id: (B,) int32. Returns (B,) f32."""
    b = feat_idx.shape[1]
    lane = 128
    b_up = pl.cdiv(b, lane) * lane
    if tile_b is None:
        if b_up <= lane:
            tile_b = lane                                    # tiny batch: single tile
        else:
            # >=2 grid steps when possible (v7x has 2 TCs); otherwise big tiles.
            tile_b = max(lane, min(TARGET_TILE_B, (b_up // (2 * lane)) * lane))
    num_tiles = pl.cdiv(b, tile_b)
    b_pad = num_tiles * tile_b

    # Only the tiny int32 streams get padded host-side (no f32 activation copy).
    feat_p = jnp.zeros((N_FEATURES, b_pad), jnp.int32).at[:, :b].set(
        feat_idx.astype(jnp.int32))
    dom_p = jnp.zeros((1, b_pad), jnp.int32).at[0, :b].set(
        domain_id.astype(jnp.int32))

    flops = b_pad * (2 * N_FEATURES * EMBED_DIM * VOCAB_PAD        # gather matmuls
                     + 2 * (H1 + 1) * D + 2 * H2 * H1              # MLP matmuls
                     + 6 * D * N_CROSS_LAYERS + 2 * (D + H2) + 8)  # cross + LR
    bytes_accessed = (b_pad * ((N_FEATURES + 1) * 4 + 4)
                      + 4 * (D * VOCAB_PAD + (H1 + 1) * D + H1
                             + 2 * D * N_CROSS_LAYERS + H2 * H1 + H2 + D + H2 + 1))

    kernel = functools.partial(dcn_md_kernel, b)   # true batch length as constant
    out = pl.pallas_call(
        kernel,
        out_shape=jax.ShapeDtypeStruct((1, b_pad), jnp.float32),
        grid=(num_tiles,),
        in_specs=[
            pl.BlockSpec((N_FEATURES, tile_b), lambda i: (0, i)),   # feature ids
            pl.BlockSpec((1, tile_b), lambda i: (0, i)),            # domain ids
            pl.BlockSpec((D, VOCAB_PAD), lambda i: (0, 0)),         # tables^T (resident)
            pl.BlockSpec((H1 + 1, D), lambda i: (0, 0)),            # W1^T ++ cross-w0 row
            pl.BlockSpec((H1, 1), lambda i: (0, 0)),                # folded MLP bias 1
            pl.BlockSpec((D, N_CROSS_LAYERS), lambda i: (0, 0)),    # cross weights (col 0 rides W1)
            pl.BlockSpec((D, N_CROSS_LAYERS), lambda i: (0, 0)),    # cross biases
            pl.BlockSpec((H2, H1), lambda i: (0, 0)),               # folded MLP W2^T
            pl.BlockSpec((H2, 1), lambda i: (0, 0)),                # folded MLP bias 2
            pl.BlockSpec((D, 1), lambda i: (0, 0)),                 # LR weight (cross part)
            pl.BlockSpec((H2, 1), lambda i: (0, 0)),                # LR weight (mlp part)
            pl.BlockSpec(memory_space=pltpu.MemorySpace.SMEM),      # LR bias scalar
        ],
        out_specs=pl.BlockSpec((1, tile_b), lambda i: (0, i)),      # lane-dense output
        compiler_params=pltpu.CompilerParams(
            dimension_semantics=("parallel",)),
        cost_estimate=pl.CostEstimate(flops=flops, transcendentals=b_pad,
                                      bytes_accessed=bytes_accessed),
    )(feat_p, dom_p,
      kparams["tabT"], kparams["w1s"], kparams["c1"],
      kparams["wct"], kparams["bct"],
      kparams["w2t"], kparams["c2"],
      kparams["wcn"], kparams["wml"], kparams["blr"])
    return out[0, :b]                                           # final.squeeze(1)


# ------------------------- parameter construction ---------------------------
def make_params(key):
    """PyTorch-equivalent (un-folded) parameters + embedding tables."""
    ks = jax.random.split(key, 12)
    eps = 1e-5

    # CrossNetwork: L linears (D -> 1, no bias) + L bias vectors
    wc = 0.1 * jax.random.normal(ks[0], (N_CROSS_LAYERS, D), jnp.float32)
    bc = jnp.zeros((N_CROSS_LAYERS, D), jnp.float32)

    # MLP layer 1: Linear(D, H1) + BatchNorm1d(H1) (eval mode)
    w1 = 0.1 * jax.random.normal(ks[1], (D, H1), jnp.float32)
    b1 = 0.1 * jax.random.normal(ks[2], (1, H1), jnp.float32)
    g1 = 1.0 + 0.1 * jax.random.normal(ks[3], (1, H1), jnp.float32)
    be1 = 0.1 * jax.random.normal(ks[4], (1, H1), jnp.float32)
    rm1 = jnp.zeros((1, H1), jnp.float32)
    rv1 = jnp.ones((1, H1), jnp.float32)
    s1 = g1 / jnp.sqrt(rv1 + eps)
    t1 = be1 - rm1 * s1

    # MLP layer 2: Linear(H1, H2) + BatchNorm1d(H2)
    w2 = 0.1 * jax.random.normal(ks[5], (H1, H2), jnp.float32)
    b2 = 0.1 * jax.random.normal(ks[6], (1, H2), jnp.float32)
    g2 = 1.0 + 0.1 * jax.random.normal(ks[7], (1, H2), jnp.float32)
    be2 = 0.1 * jax.random.normal(ks[8], (1, H2), jnp.float32)
    rm2 = jnp.zeros((1, H2), jnp.float32)
    rv2 = jnp.ones((1, H2), jnp.float32)
    s2 = g2 / jnp.sqrt(rv2 + eps)
    t2 = be2 - rm2 * s2

    # LR head: Linear(D + H2, 1, bias=True)
    wlr = 0.1 * jax.random.normal(ks[9], (LR_IN, 1), jnp.float32)
    blr = 0.1 * jax.random.normal(ks[10], (1, 1), jnp.float32)

    # Embedding tables (one per sparse feature)
    tables = 0.1 * jax.random.normal(ks[11], (N_FEATURES, VOCAB, EMBED_DIM),
                                     jnp.float32)

    params = dict(wc=wc, bc=bc, w1=w1, b1=b1, s1=s1, t1=t1,
                  w2=w2, b2=b2, s2=s2, t2=t2, wlr=wlr, blr=blr)
    return params, tables


def fold_params(p, tables):
    """Host-side folding: BN(eval)+bias into weights, layer-0 cross weight into
    the W1 matmul, and tables transposed/vocab-padded for the in-kernel gather."""
    w1f = p["w1"] * p["s1"]                  # (D, H1)
    c1 = p["b1"] * p["s1"] + p["t1"]         # (1, H1)
    w2f = p["w2"] * p["s2"]                  # (H1, H2)
    c2 = p["b2"] * p["s2"] + p["t2"]         # (1, H2)

    # Transposed, vocab-padded embedding tables stacked along features: (D, VOCAB_PAD)
    tabT = jnp.zeros((D, VOCAB_PAD), jnp.float32)
    for f in range(N_FEATURES):
        tabT = tabT.at[f * EMBED_DIM:(f + 1) * EMBED_DIM, :VOCAB].set(tables[f].T)

    # W1^T with the cross-layer-0 weight riding as row H1 (same MXU pass)
    w1s = jnp.concatenate([w1f.T, p["wc"][0:1, :]], axis=0)   # (H1+1, D)

    return dict(
        tabT=tabT,                         # (D, VOCAB_PAD)
        w1s=w1s,                           # (H1+1, D)
        c1=c1.T,                           # (H1, 1)
        wct=p["wc"].T,                     # (D, L)  (column 0 unused in-kernel)
        bct=p["bc"].T,                     # (D, L)
        w2t=w2f.T,                         # (H2, H1)
        c2=c2.T,                           # (H2, 1)
        wcn=p["wlr"][:D, :],               # (D, 1)
        wml=p["wlr"][D:, :],               # (H2, 1)
        blr=p["blr"],                      # (1, 1) -> SMEM scalar
    )


# ------------------------------ reference -----------------------------------
def embedding_lookup(tables, feat_idx):
    """feat_idx: (N_FEATURES, B) int32 -> embed_x (B, D). Plain-JAX gather."""
    embs = [tables[f][feat_idx[f]] for f in range(N_FEATURES)]  # each (B, EMBED_DIM)
    return jnp.concatenate(embs, axis=1)                        # (B, D)


def reference_forward(feat_idx, domain_id, p, tables):
    x0 = embedding_lookup(tables, feat_idx)
    x = x0
    for l in range(N_CROSS_LAYERS):
        xw = jnp.sum(x * p["wc"][l][None, :], axis=1, keepdims=True)
        x = x0 * xw + p["bc"][l][None, :] + x
    h = jnp.dot(x0, p["w1"], precision=MXU_PRECISION)
    h = jnp.maximum((h + p["b1"]) * p["s1"] + p["t1"], 0.0)
    h = jnp.dot(h, p["w2"], precision=MXU_PRECISION)
    h = jnp.maximum((h + p["b2"]) * p["s2"] + p["t2"], 0.0)
    stack = jnp.concatenate([x, h], axis=1)
    prob = jax.nn.sigmoid(jnp.dot(stack, p["wlr"], precision=MXU_PRECISION)
                          + p["blr"][0, 0])
    final = jnp.zeros_like(prob)
    for d in range(NUM_DOMAINS):
        final = jnp.where((domain_id == d)[:, None], prob, final)
    return final[:, 0]


# -------------------------------- main ---------------------------------------
if __name__ == "__main__":
    key = jax.random.PRNGKey(0)
    kp, ki, kd = jax.random.split(key, 3)

    params, tables = make_params(kp)
    kparams = fold_params(params, tables)

    # synthetic input dict contents: sparse feature ids + domain_indicator
    feat_idx = jax.random.randint(ki, (N_FEATURES, B), 0, VOCAB, dtype=jnp.int32)
    domain_id = jax.random.randint(kd, (B,), 0, NUM_DOMAINS, dtype=jnp.int32)

    out = jax.block_until_ready(dcn_md_forward(feat_idx, domain_id, kparams))
    ref = reference_forward(feat_idx, domain_id, params, tables)

    assert out.shape == (B,)
    assert jnp.allclose(out, ref, atol=1e-3, rtol=1e-3), (out, ref)
    print("KERNEL_OK")
</pallas_src>

<mosaic_0001>
module attributes {stable_mosaic.version = 11 : i64} {
  func.func @dcn_md_kernel(%arg0: i32, %arg1: memref<4x128xi32, #tpu.memory_space<vmem>>, %arg2: memref<1x128xi32, #tpu.memory_space<vmem>>, %arg3: memref<32x56xf32, #tpu.memory_space<vmem>>, %arg4: memref<17x32xf32, #tpu.memory_space<vmem>>, %arg5: memref<16x1xf32, #tpu.memory_space<vmem>>, %arg6: memref<32x2xf32, #tpu.memory_space<vmem>>, %arg7: memref<32x2xf32, #tpu.memory_space<vmem>>, %arg8: memref<8x16xf32, #tpu.memory_space<vmem>>, %arg9: memref<8x1xf32, #tpu.memory_space<vmem>>, %arg10: memref<32x1xf32, #tpu.memory_space<vmem>>, %arg11: memref<8x1xf32, #tpu.memory_space<vmem>>, %arg12: memref<1x1xf32, #tpu.memory_space<smem>>, %arg13: memref<1x128xf32, #tpu.memory_space<vmem>>) attributes {dimension_semantics = [#tpu.dimension_semantics<parallel>], iteration_bounds = array<i64: 2>, scalar_prefetch = 0 : i64, scratch_operands = 0 : i64, tpu.core_type = #tpu.core_type<tc>, window_params = [{transform_indices = @transform_0, window_bounds = array<i64: 4, 128>}, {transform_indices = @transform_1, window_bounds = array<i64: 1, 128>}, {pipeline_mode = #tpu.pipeline_mode<synchronous>, transform_indices = @transform_2, window_bounds = array<i64: 32, 56>}, {pipeline_mode = #tpu.pipeline_mode<synchronous>, transform_indices = @transform_3, window_bounds = array<i64: 17, 32>}, {pipeline_mode = #tpu.pipeline_mode<synchronous>, transform_indices = @transform_4, window_bounds = array<i64: 16, 1>}, {pipeline_mode = #tpu.pipeline_mode<synchronous>, transform_indices = @transform_5, window_bounds = array<i64: 32, 2>}, {pipeline_mode = #tpu.pipeline_mode<synchronous>, transform_indices = @transform_6, window_bounds = array<i64: 32, 2>}, {pipeline_mode = #tpu.pipeline_mode<synchronous>, transform_indices = @transform_7, window_bounds = array<i64: 8, 16>}, {pipeline_mode = #tpu.pipeline_mode<synchronous>, transform_indices = @transform_8, window_bounds = array<i64: 8, 1>}, {pipeline_mode = #tpu.pipeline_mode<synchronous>, transform_indices = @transform_9, window_bounds = array<i64: 32, 1>}, {pipeline_mode = #tpu.pipeline_mode<synchronous>, transform_indices = @transform_10, window_bounds = array<i64: 8, 1>}, {transform_indices = @transform_11, window_bounds = array<i64: 1, 1>}, {transform_indices = @transform_12, window_bounds = array<i64: 1, 128>}]} {
    %0 = tpu.iota {dimensions = array<i32: 0>} : vector<56x128xi32>
    %c0 = arith.constant 0 : index
    %c0_0 = arith.constant 0 : index
    %1 = vector.load %arg1[%c0, %c0_0] : memref<4x128xi32, #tpu.memory_space<vmem>>, vector<1x128xi32>
    %2 = vector.broadcast %1 : vector<1x128xi32> to vector<56x128xi32>
    %3 = arith.cmpi eq, %0, %2 : vector<56x128xi32>
    %4 = arith.extui %3 : vector<56x128xi1> to vector<56x128xi32>
    %5 = arith.sitofp %4 : vector<56x128xi32> to vector<56x128xf32>
    %c0_1 = arith.constant 0 : index
    %c0_2 = arith.constant 0 : index
    %6 = vector.load %arg3[%c0_1, %c0_2] : memref<32x56xf32, #tpu.memory_space<vmem>>, vector<8x56xf32>
    %cst = arith.constant dense<0.000000e+00> : vector<8x128xf32>
    %7 = tpu.matmul %6, %5, %cst {dimension_numbers = #tpu.dot_dimension_numbers<[1], [0], [0], [1], [0, 0, 1, 1], [], []>, precision = #tpu.contract_precision<fp32>} : vector<8x56xf32>, vector<56x128xf32>, vector<8x128xf32> -> vector<8x128xf32>
    %c1 = arith.constant 1 : index
    %c0_3 = arith.constant 0 : index
    %8 = vector.load %arg1[%c1, %c0_3] : memref<4x128xi32, #tpu.memory_space<vmem>>, vector<1x128xi32>
    %9 = vector.broadcast %8 : vector<1x128xi32> to vector<56x128xi32>
    %10 = arith.cmpi eq, %0, %9 : vector<56x128xi32>
    %11 = arith.extui %10 : vector<56x128xi1> to vector<56x128xi32>
    %12 = arith.sitofp %11 : vector<56x128xi32> to vector<56x128xf32>
    %c8 = arith.constant 8 : index
    %c0_4 = arith.constant 0 : index
    %13 = vector.load %arg3[%c8, %c0_4] : memref<32x56xf32, #tpu.memory_space<vmem>>, vector<8x56xf32>
    %cst_5 = arith.constant dense<0.000000e+00> : vector<8x128xf32>
    %14 = tpu.matmul %13, %12, %cst_5 {dimension_numbers = #tpu.dot_dimension_numbers<[1], [0], [0], [1], [0, 0, 1, 1], [], []>, precision = #tpu.contract_precision<fp32>} : vector<8x56xf32>, vector<56x128xf32>, vector<8x128xf32> -> vector<8x128xf32>
    %c2 = arith.constant 2 : index
    %c0_6 = arith.constant 0 : index
    %15 = vector.load %arg1[%c2, %c0_6] : memref<4x128xi32, #tpu.memory_space<vmem>>, vector<1x128xi32>
    %16 = vector.broadcast %15 : vector<1x128xi32> to vector<56x128xi32>
    %17 = arith.cmpi eq, %0, %16 : vector<56x128xi32>
    %18 = arith.extui %17 : vector<56x128xi1> to vector<56x128xi32>
    %19 = arith.sitofp %18 : vector<56x128xi32> to vector<56x128xf32>
    %c16 = arith.constant 16 : index
    %c0_7 = arith.constant 0 : index
    %20 = vector.load %arg3[%c16, %c0_7] : memref<32x56xf32, #tpu.memory_space<vmem>>, vector<8x56xf32>
    %cst_8 = arith.constant dense<0.000000e+00> : vector<8x128xf32>
    %21 = tpu.matmul %20, %19, %cst_8 {dimension_numbers = #tpu.dot_dimension_numbers<[1], [0], [0], [1], [0, 0, 1, 1], [], []>, precision = #tpu.contract_precision<fp32>} : vector<8x56xf32>, vector<56x128xf32>, vector<8x128xf32> -> vector<8x128xf32>
    %c3 = arith.constant 3 : index
    %c0_9 = arith.constant 0 : index
    %22 = vector.load %arg1[%c3, %c0_9] : memref<4x128xi32, #tpu.memory_space<vmem>>, vector<1x128xi32>
    %23 = vector.broadcast %22 : vector<1x128xi32> to vector<56x128xi32>
    %24 = arith.cmpi eq, %0, %23 : vector<56x128xi32>
    %25 = arith.extui %24 : vector<56x128xi1> to vector<56x128xi32>
    %26 = arith.sitofp %25 : vector<56x128xi32> to vector<56x128xf32>
    %c24 = arith.constant 24 : index
    %c0_10 = arith.constant 0 : index
    %27 = vector.load %arg3[%c24, %c0_10] : memref<32x56xf32, #tpu.memory_space<vmem>>, vector<8x56xf32>
    %cst_11 = arith.constant dense<0.000000e+00> : vector<8x128xf32>
    %28 = tpu.matmul %27, %26, %cst_11 {dimension_numbers = #tpu.dot_dimension_numbers<[1], [0], [0], [1], [0, 0, 1, 1], [], []>, precision = #tpu.contract_precision<fp32>} : vector<8x56xf32>, vector<56x128xf32>, vector<8x128xf32> -> vector<8x128xf32>
    %29 = tpu.concatenate %7, %14, %21, %28 in 0 : vector<8x128xf32>, vector<8x128xf32>, vector<8x128xf32>, vector<8x128xf32> -> vector<32x128xf32>
    %c0_12 = arith.constant 0 : index
    %c0_13 = arith.constant 0 : index
    %30 = vector.load %arg4[%c0_12, %c0_13] : memref<17x32xf32, #tpu.memory_space<vmem>>, vector<17x32xf32>
    %cst_14 = arith.constant dense<0.000000e+00> : vector<17x128xf32>
    %31 = tpu.matmul %30, %29, %cst_14 {dimension_numbers = #tpu.dot_dimension_numbers<[1], [0], [0], [1], [0, 0, 1, 1], [], []>, precision = #tpu.contract_precision<fp32>} : vector<17x32xf32>, vector<32x128xf32>, vector<17x128xf32> -> vector<17x128xf32>
    %32 = vector.extract_strided_slice %31 {offsets = [0, 0], sizes = [16, 128], strides = [1, 1]} : vector<17x128xf32> to vector<16x128xf32>
    %c0_15 = arith.constant 0 : index
    %c0_16 = arith.constant 0 : index
    %33 = vector.load %arg5[%c0_15, %c0_16] : memref<16x1xf32, #tpu.memory_space<vmem>>, vector<16x1xf32>
    %34 = vector.broadcast %33 : vector<16x1xf32> to vector<16x128xf32>
    %35 = arith.addf %32, %34 : vector<16x128xf32>
    %cst_17 = arith.constant 0.000000e+00 : f32
    %36 = vector.broadcast %cst_17 : f32 to vector<16x128xf32>
    %37 = arith.maximumf %35, %36 : vector<16x128xf32>
    %38 = vector.extract_strided_slice %31 {offsets = [16, 0], sizes = [1, 128], strides = [1, 1]} : vector<17x128xf32> to vector<1x128xf32>
    %39 = vector.broadcast %38 : vector<1x128xf32> to vector<32x128xf32>
    %40 = arith.mulf %29, %39 : vector<32x128xf32>
    %c0_18 = arith.constant 0 : index
    %c0_19 = arith.constant 0 : index
    %41 = vector.load %arg7[%c0_18, %c0_19] : memref<32x2xf32, #tpu.memory_space<vmem>>, vector<32x1xf32>
    %42 = vector.broadcast %41 : vector<32x1xf32> to vector<32x128xf32>
    %43 = arith.addf %40, %42 : vector<32x128xf32>
    %44 = arith.addf %43, %29 : vector<32x128xf32>
    %c0_20 = arith.constant 0 : index
    %c1_21 = arith.constant 1 : index
    %45 = vector.load %arg6[%c0_20, %c1_21] : memref<32x2xf32, #tpu.memory_space<vmem>>, vector<32x1xf32>
    %46 = vector.broadcast %45 : vector<32x1xf32> to vector<32x128xf32>
    %47 = arith.mulf %44, %46 : vector<32x128xf32>
    %cst_22 = arith.constant dense<0.000000e+00> : vector<128xf32>
    %48 = vector.multi_reduction <add>, %47, %cst_22 [0] : vector<32x128xf32> to vector<128xf32>
    %49 = vector.shape_cast %48 : vector<128xf32> to vector<1x128xf32>
    %50 = vector.broadcast %49 : vector<1x128xf32> to vector<32x128xf32>
    %51 = arith.mulf %29, %50 : vector<32x128xf32>
    %c0_23 = arith.constant 0 : index
    %c1_24 = arith.constant 1 : index
    %52 = vector.load %arg7[%c0_23, %c1_24] : memref<32x2xf32, #tpu.memory_space<vmem>>, vector<32x1xf32>
    %53 = vector.broadcast %52 : vector<32x1xf32> to vector<32x128xf32>
    %54 = arith.addf %51, %53 : vector<32x128xf32>
    %55 = arith.addf %54, %44 : vector<32x128xf32>
    %c0_25 = arith.constant 0 : index
    %c0_26 = arith.constant 0 : index
    %56 = vector.load %arg8[%c0_25, %c0_26] : memref<8x16xf32, #tpu.memory_space<vmem>>, vector<8x16xf32>
    %cst_27 = arith.constant dense<0.000000e+00> : vector<8x128xf32>
    %57 = tpu.matmul %56, %37, %cst_27 {dimension_numbers = #tpu.dot_dimension_numbers<[1], [0], [0], [1], [0, 0, 1, 1], [], []>, precision = #tpu.contract_precision<fp32>} : vector<8x16xf32>, vector<16x128xf32>, vector<8x128xf32> -> vector<8x128xf32>
    %c0_28 = arith.constant 0 : index
    %c0_29 = arith.constant 0 : index
    %58 = vector.load %arg9[%c0_28, %c0_29] : memref<8x1xf32, #tpu.memory_space<vmem>>, vector<8x1xf32>
    %59 = vector.broadcast %58 : vector<8x1xf32> to vector<8x128xf32>
    %60 = arith.addf %57, %59 : vector<8x128xf32>
    %cst_30 = arith.constant 0.000000e+00 : f32
    %61 = vector.broadcast %cst_30 : f32 to vector<8x128xf32>
    %62 = arith.maximumf %60, %61 : vector<8x128xf32>
    %c0_31 = arith.constant 0 : index
    %c0_32 = arith.constant 0 : index
    %63 = vector.load %arg10[%c0_31, %c0_32] : memref<32x1xf32, #tpu.memory_space<vmem>>, vector<32x1xf32>
    %64 = vector.broadcast %63 : vector<32x1xf32> to vector<32x128xf32>
    %65 = arith.mulf %55, %64 : vector<32x128xf32>
    %cst_33 = arith.constant dense<0.000000e+00> : vector<128xf32>
    %66 = vector.multi_reduction <add>, %65, %cst_33 [0] : vector<32x128xf32> to vector<128xf32>
    %67 = vector.shape_cast %66 : vector<128xf32> to vector<1x128xf32>
    %c0_34 = arith.constant 0 : index
    %c0_35 = arith.constant 0 : index
    %68 = vector.load %arg11[%c0_34, %c0_35] : memref<8x1xf32, #tpu.memory_space<vmem>>, vector<8x1xf32>
    %69 = vector.broadcast %68 : vector<8x1xf32> to vector<8x128xf32>
    %70 = arith.mulf %62, %69 : vector<8x128xf32>
    %cst_36 = arith.constant dense<0.000000e+00> : vector<128xf32>
    %71 = vector.multi_reduction <add>, %70, %cst_36 [0] : vector<8x128xf32> to vector<128xf32>
    %72 = vector.shape_cast %71 : vector<128xf32> to vector<1x128xf32>
    %73 = arith.addf %67, %72 : vector<1x128xf32>
    %c0_37 = arith.constant 0 : index
    %c0_38 = arith.constant 0 : index
    %74 = memref.load %arg12[%c0_37, %c0_38] : memref<1x1xf32, #tpu.memory_space<smem>>
    %75 = vector.broadcast %74 : f32 to vector<1x128xf32>
    %76 = arith.addf %73, %75 : vector<1x128xf32>
    %77 = arith.negf %76 : vector<1x128xf32>
    %78 = math.exp %77 : vector<1x128xf32>
    %cst_39 = arith.constant 1.000000e+00 : f32
    %79 = vector.broadcast %cst_39 : f32 to vector<1x128xf32>
    %80 = arith.addf %79, %78 : vector<1x128xf32>
    %81 = arith.divf %79, %80 : vector<1x128xf32>
    %c128_i32 = arith.constant 128 : i32
    %82 = arith.muli %arg0, %c128_i32 : i32
    %83 = tpu.iota {dimensions = array<i32: 1>} : vector<1x128xi32>
    %84 = vector.broadcast %82 : i32 to vector<1x128xi32>
    %85 = arith.addi %84, %83 : vector<1x128xi32>
    %c0_40 = arith.constant 0 : index
    %c0_41 = arith.constant 0 : index
    %86 = vector.load %arg2[%c0_40, %c0_41] : memref<1x128xi32, #tpu.memory_space<vmem>>, vector<1x128xi32>
    %c200_i32 = arith.constant 200 : i32
    %87 = vector.broadcast %c200_i32 : i32 to vector<1x128xi32>
    %88 = arith.cmpi slt, %85, %87 : vector<1x128xi32>
    %c0_i32 = arith.constant 0 : i32
    %89 = vector.broadcast %c0_i32 : i32 to vector<1x128xi32>
    %90 = arith.cmpi sge, %86, %89 : vector<1x128xi32>
    %91 = arith.andi %88, %90 : vector<1x128xi1>
    %c3_i32 = arith.constant 3 : i32
    %92 = vector.broadcast %c3_i32 : i32 to vector<1x128xi32>
    %93 = arith.cmpi slt, %86, %92 : vector<1x128xi32>
    %94 = arith.andi %91, %93 : vector<1x128xi1>
    %cst_42 = arith.constant 0.000000e+00 : f32
    %95 = vector.broadcast %cst_42 : f32 to vector<1x128xf32>
    %96 = arith.select %94, %81, %95 : vector<1x128xi1>, vector<1x128xf32>
    %c0_43 = arith.constant 0 : index
    %c0_44 = arith.constant 0 : index
    %97 = vector.load %arg13[%c0_43, %c0_44] : memref<1x128xf32, #tpu.memory_space<vmem>>, vector<1x128xf32>
    tpu.vector_store %arg13[%c0_43, %c0_44], %96 {strides = array<i32>} : memref<1x128xf32, #tpu.memory_space<vmem>>, vector<1x128xf32>,
    return
  }
  func.func @transform_0(%arg0: i32) -> (i32, i32) {
    %c0_i32 = arith.constant 0 : i32
    %c0_i32_0 = arith.constant 0 : i32
    return %c0_i32, %arg0 : i32, i32
  }
  func.func @transform_1(%arg0: i32) -> (i32, i32) {
    %c0_i32 = arith.constant 0 : i32
    %c0_i32_0 = arith.constant 0 : i32
    return %c0_i32, %arg0 : i32, i32
  }
  func.func @transform_2(%arg0: i32) -> (i32, i32) {
    %c0_i32 = arith.constant 0 : i32
    %c0_i32_0 = arith.constant 0 : i32
    %c0_i32_1 = arith.constant 0 : i32
    return %c0_i32, %c0_i32_0 : i32, i32
  }
  func.func @transform_3(%arg0: i32) -> (i32, i32) {
    %c0_i32 = arith.constant 0 : i32
    %c0_i32_0 = arith.constant 0 : i32
    %c0_i32_1 = arith.constant 0 : i32
    return %c0_i32, %c0_i32_0 : i32, i32
  }
  func.func @transform_4(%arg0: i32) -> (i32, i32) {
    %c0_i32 = arith.constant 0 : i32
    %c0_i32_0 = arith.constant 0 : i32
    %c0_i32_1 = arith.constant 0 : i32
    return %c0_i32, %c0_i32_0 : i32, i32
  }
  func.func @transform_5(%arg0: i32) -> (i32, i32) {
    %c0_i32 = arith.constant 0 : i32
    %c0_i32_0 = arith.constant 0 : i32
    %c0_i32_1 = arith.constant 0 : i32
    return %c0_i32, %c0_i32_0 : i32, i32
  }
  func.func @transform_6(%arg0: i32) -> (i32, i32) {
    %c0_i32 = arith.constant 0 : i32
    %c0_i32_0 = arith.constant 0 : i32
    %c0_i32_1 = arith.constant 0 : i32
    return %c0_i32, %c0_i32_0 : i32, i32
  }
  func.func @transform_7(%arg0: i32) -> (i32, i32) {
    %c0_i32 = arith.constant 0 : i32
    %c0_i32_0 = arith.constant 0 : i32
    %c0_i32_1 = arith.constant 0 : i32
    return %c0_i32, %c0_i32_0 : i32, i32
  }
  func.func @transform_8(%arg0: i32) -> (i32, i32) {
    %c0_i32 = arith.constant 0 : i32
    %c0_i32_0 = arith.constant 0 : i32
    %c0_i32_1 = arith.constant 0 : i32
    return %c0_i32, %c0_i32_0 : i32, i32
  }
  func.func @transform_9(%arg0: i32) -> (i32, i32) {
    %c0_i32 = arith.constant 0 : i32
    %c0_i32_0 = arith.constant 0 : i32
    %c0_i32_1 = arith.constant 0 : i32
    return %c0_i32, %c0_i32_0 : i32, i32
  }
  func.func @transform_10(%arg0: i32) -> (i32, i32) {
    %c0_i32 = arith.constant 0 : i32
    %c0_i32_0 = arith.constant 0 : i32
    %c0_i32_1 = arith.constant 0 : i32
    return %c0_i32, %c0_i32_0 : i32, i32
  }
  func.func @transform_11(%arg0: i32) -> (i32, i32) {
    %c0_i32 = arith.constant 0 : i32
    %c0_i32_0 = arith.constant 0 : i32
    %c0_i32_1 = arith.constant 0 : i32
    return %c0_i32, %c0_i32_0 : i32, i32
  }
  func.func @transform_12(%arg0: i32) -> (i32, i32) {
    %c0_i32 = arith.constant 0 : i32
    %c0_i32_0 = arith.constant 0 : i32
    return %c0_i32, %arg0 : i32, i32
  }
}

</mosaic_0001>

<bundles_post_ra>
// kernel: tpu_custom_call.1
= control target key start
LH: loop header
LB: loop body
LE: loop exit
PB: predicated region body
PF: predicated region fallthrough
CT: control target
= control target key end

     0   :  { %s6649_s0 = inlined_call_operand.vmem [shape: s32[4,256], index: 0, kind: input, shape index: {}]   ;;  %s6650_s1 = inlined_call_operand.vmem [shape: s32[1,256], index: 1, kind: input, shape index: {}]   ;;  %s6651_s2 = inlined_call_operand.vmem [shape: f32[32,56], index: 2, kind: input, shape index: {}]   ;;  %s6652_s3 = inlined_call_operand.vmem [shape: f32[17,32], index: 3, kind: input, shape index: {}]   ;;  %s6653_s4 = inlined_call_operand.vmem [shape: f32[16,1], index: 4, kind: input, shape index: {}]   ;;  %s6654_s5 = inlined_call_operand.vmem [shape: f32[32,2], index: 5, kind: input, shape index: {}]   ;;  %s6655_s6 = inlined_call_operand.vmem [shape: f32[32,2], index: 6, kind: input, shape index: {}]   ;;  %s6656_s7 = inlined_call_operand.vmem [shape: f32[8,16], index: 7, kind: input, shape index: {}]   ;;  %s6657_s8 = inlined_call_operand.vmem [shape: f32[8,1], index: 8, kind: input, shape index: {}]   ;;  %s6658_s9 = inlined_call_operand.vmem [shape: f32[32,1], index: 9, kind: input, shape index: {}]   ;;  %s6659_s10 = inlined_call_operand.vmem [shape: f32[8,1], index: 10, kind: input, shape index: {}]   ;;  %s6660_s11 = inlined_call_operand.<no memory space> [shape: f32[1,1], index: 11, kind: input, shape index: {}]   ;;  %s6661_s12 = inlined_call_operand.hbm [shape: f32[1,256], index: 12, kind: output, shape index: {}]  }
   0x1   :  { %6675 = sst [smem:[#allocation6_spill]] %s6649_s0 }
   0x2   :  { %17 = sst [smem:[#allocation2]] %s6660_s11 }
   0x3   :  { %18 = vsyncpa [#allocation4], 0 }
   0x4   :  { %20 = vsyncpa [#allocation4 + $0x1], 0  ;;  %s5430_s23 = smov 0   ;;  %s5432_s24 = smov 0  }
   0x5   :  { %s5434_s25 = smov 0   ;;  %s5436_s26 = smov 0  }
   0x6 LB: > { %s5451_s11 = sadd.s32 4294967295, %s5352_s26   ;;  %s3974_s27 = sadd.s32 4294967294, %s5352_s26   ;;  %s5352_s26 = sphi %s5436_s26, %s6726_s26   ;;  %s5348_s25 = sphi %s5434_s25, %s6725_s25   ;;  %s5344_s24 = sphi %s5432_s24, %s6724_s24   ;;  %s5340_s23 = sphi %s5430_s23, %s6723_s23  }
   0x7   : > { %s5455_s28 = sadd.s32 1, %s5352_s26   ;;  %s295_s29 = sadd.s32 1, %s5348_s25 }
   0x8   : > { %s292_s30 = ssub.s32 %s5352_s26, %s5455_s28  ;;  %p305_p0 = scmp.ne.s32.totalorder %s5348_s25, %s5344_s24 }
   0x9   : > { %p293_p1 = scmp.eq.s32.totalorder %s292_s30, 0  ;;  %p306_p2 = scmp.eq.s32.totalorder %s5451_s11, 1 }
   0xa   : > { %p311_p3 = scmp.ne.s32.totalorder %s5344_s24, %s5340_s23  ;;  %p312_p4 = scmp.eq.s32.totalorder %s3974_s27, 1 }
   0xb   : > { %s5466_s13 = scalar_select %p293_p1, %s5348_s25, %s295_s29  }
   0xc   : > { %p5468_p5 = por %p306_p2, %p305_p0  ;;  %p5472_p6 = por %p312_p4, %p311_p3 }
   0xd   : > { %p3977_p7 = scmp.ge.s32.totalorder %s5352_s26, 1  ;;  %p373_p8 = scmp.lt.s32.totalorder %s5352_s26, 3 }
   0xf   : > { %p374_p9 = pnand %p3977_p7, %p373_p8 }
  0x10   : > { %p416_p10 = scmp.lt.s32.totalorder (!%p374_p9), %s5451_s11, 1  ;;  %v6662_v0 = vlaneseq (!%p374_p9)  ;;  %v457_v1 = vld [vmem:[%s6651_s2] sm:$0xff] (!%p374_p9)  ;;  %v5354_v2 = vmov (!%p374_p9), 0.0|0.0   ;;  %vm6669_vm0 = vcmask (!%p374_p9), 457728   ;;  %vm5355_vm1 = vmmov (!%p374_p9), 0   ;;  %s6678_s0 = sld [smem:[#allocation6_spill]] (!%p374_p9) }
  0x11   : > { %377 = sbr.rel (%p374_p9) target bundleno = 1050 (0x41a), region = 68  ;;  %4904 = vmatprep.subr.bf16.mxu1 (!%p374_p9), %v5354_v2  ;;  %4922 = vmatprep.subr.bf16.mxu0 (!%p374_p9), %v5354_v2  ;;  %v5356_v4 = vmov (!%p374_p9), 0.0   ;;  %v460_v5 = vsel (!%p374_p9), %vm6669_vm0, %v457_v1, 0  ;;  %v5357_v19 = vmov (!%p374_p9), 1.0|1.0   ;;  %v5358_v55 = vmov (!%p374_p9), 1.0  }
  0x12   : > { %v5488_v3 = vshrl.u32 (!%p374_p9), %v6662_v0, 7  ;;  %4366 = vmatprep.mubr.msk.f32.mxu1 (!%p374_p9), %vm5355_vm1, %v5356_v4  ;;  %4400 = vmatprep.mubr.msk.f32.mxu0 (!%p374_p9), %vm5355_vm1, %v5356_v4  ;;  %v5495_v6 = vand.u32 (!%p374_p9), 4294901760, %v460_v5  ;;  %v1012_v57 = vld [vmem:[%s6651_s2 + $0x8] sm:$0xff] (!%p374_p9)  ;;  %s4096_s21 = sshll.u32 (!%p374_p9), %s5451_s11, 7  ;;  %s414_s30 = sand.u32 (!%p374_p9), 1, %s5344_s24  }
  0x13   : > { %v1014_v63 = vsel (!%p374_p9), %vm6669_vm0, %v1012_v57, 0  ;;  %s4097_s16 = sshll.u32 (!%p374_p9), %s5451_s11, 4  ;;  %s415_s17 = scalar_lea.vmem (!%p374_p9), [#allocation3], %s414_s30 }
  0x14   : > { %v5499_v7 = vadd.s32 (!%p374_p9), 8, %v5488_v3  ;;  %v5502_v8 = vadd.s32 (!%p374_p9), 16, %v5488_v3  ;;  %v5505_v9 = vadd.s32 (!%p374_p9), 24, %v5488_v3  ;;  %v5516_v11 = vadd.s32 (!%p374_p9), 32, %v5488_v3 }
  0x15   : > { %v5519_v12 = vadd.s32 (!%p374_p9), 40, %v5488_v3  ;;  %v5522_v13 = vsub.f32 (!%p374_p9), %v460_v5, %v5495_v6  ;;  %v5561_v25 = vadd.s32 (!%p374_p9), 48, %v5488_v3 }
  0x17   : > { %v536_v26 = vand.u32 (!%p374_p9), 4294901760, %v5522_v13 }
  0x18   : > { %s5485_s18 = scalar_select %p416_p10, %s5451_s11, 1 }
  0x19   : > { %v537_v40 = vsub.f32 %v5522_v13, %v536_v26  ;;  %s5361_s11 = smov [#allocation3]  }
  0x1a   : > { %s3978_s19 = sshll.u32 %s5485_s18, 2  ;;  %s422_s29 = scalar_lea.vmem %s6650_s1, %s5485_s18 }
  0x1b   : > { %s5510_s22 = scalar_lea.vmem %s6678_s0, %s3978_s19  ;;  %v538_v48 = vand.u32 4294901760, %v537_v40  ;;  %s3875_s0 = sld [smem:[#allocation2]] }
  0x1c   : > { %v5513_v10 = vld [vmem:[%s5510_s22] ss:$0 sm:$0xff]  ;;  %v5650_v62 = vld [vmem:[%s5510_s22 + $0x1] ss:$0 sm:$0xff]  ;;  %s3910_s19 = sshll.u32 %s415_s17, 4  ;;  %s6607_s18 = scalar_lea.hbm %s6661_s12, %s4097_s16  ;;  %s6609_s19 = int_to_ptr.vmem [resolvable:$true] %s3910_s19 }
  0x1d   : > { %vm436_vm2 = vcmp.eq.s32.totalorder %v5488_v3, %v5513_v10  ;;  %vm437_vm3 = vcmp.eq.s32.totalorder %v5499_v7, %v5513_v10  ;;  %vm438_vm4 = vcmp.eq.s32.totalorder %v5502_v8, %v5513_v10  ;;  %vm439_vm5 = vcmp.eq.s32.totalorder %v5505_v9, %v5513_v10  ;;  %s5294_s27 = sshll.u32 %s5361_s11, 4  ;;  %s5295_s27 = int_to_ptr.vmem [resolvable:$false] %s5294_s27 }
  0x1e   : > { %v3980_v14 = vsel %vm436_vm2, 1.0, %v5356_v4  ;;  %v3981_v15 = vsel %vm437_vm3, 1.0, %v5356_v4  ;;  %vm5534_vm6 = vmpackc.low %vm437_vm3, %vm436_vm2  ;;  %v3982_v17 = vsel %vm438_vm4, 1.0, %v5356_v4  ;;  %v3983_v18 = vsel %vm439_vm5, 1.0, %v5356_v4  ;;  %p5297_p0 = scmp.lt.s32.totalorder %s6609_s19, %s5295_s27 }
  0x1f   : > { %4906 = vmatpush3.bf16.msk.msra.mxu1 %vm5534_vm6, %v5357_v19  ;;  %v5543_v20 = vsub.f32 %v3980_v14, %v3980_v14  ;;  %v5545_v21 = vsub.f32 %v3981_v15, %v3981_v15  ;;  %v5547_v22 = vsub.f32 %v3982_v17, %v3982_v17  ;;  %v5549_v23 = vsub.f32 %v3983_v18, %v3983_v18  ;;  %vm5552_vm7 = vmpackc.low %vm439_vm5, %vm438_vm4 }
  0x20   : > { %4907 = vmatprep.subr.bf16.mxu1 %v5354_v2  ;;  %vm440_vm8 = vcmp.eq.s32.totalorder %v5516_v11, %v5513_v10  ;;  %vm441_vm9 = vcmp.eq.s32.totalorder %v5519_v12, %v5513_v10  ;;  %vm442_vm11 = vcmp.eq.s32.totalorder %v5561_v25, %v5513_v10  ;;  %vm991_vm12 = vcmp.eq.s32.totalorder %v5488_v3, %v5650_v62 }
  0x21   : > { %v547_v27 = vand.u32 4294901760, %v5543_v20  ;;  %v554_v28 = vand.u32 4294901760, %v5545_v21  ;;  %v561_v29 = vand.u32 4294901760, %v5547_v22  ;;  %v568_v30 = vand.u32 4294901760, %v5549_v23  ;;  %vm5594_vm10 = vmpackc.low %vm441_vm9, %vm440_vm8 }
  0x22   : > { %v4923_v31 = vpack.c.bf16 %v5545_v21, %v5543_v20  ;;  %v3984_v32 = vsel %vm440_vm8, 1.0, %v5356_v4  ;;  %v3985_v33 = vsel %vm441_vm9, 1.0, %v5356_v4  ;;  %v4926_v39 = vpack.c.bf16 %v5549_v23, %v5547_v22 }
  0x23   : > { %v548_v34 = vsub.f32 %v5543_v20, %v547_v27  ;;  %v555_v35 = vsub.f32 %v5545_v21, %v554_v28  ;;  %4909 = vmatpush3.bf16.msk.msra.mxu1 %vm5552_vm7, %v5357_v19  ;;  %v5598_v37 = vsub.f32 %v3984_v32, %v3984_v32  ;;  %v5600_v38 = vsub.f32 %v3985_v33, %v3985_v33 }
  0x24   : > { %4924 = vmatpush3.bf16.msra.mxu0 %v4923_v31  ;;  %4910 = vmatprep.subr.bf16.mxu1 %v5354_v2  ;;  %v562_v41 = vsub.f32 %v5547_v22, %v561_v29  ;;  %v569_v42 = vsub.f32 %v5549_v23, %v568_v30  ;;  %v3986_v49 = vsel %vm442_vm11, 1.0, %v5356_v4  ;;  %vm992_vm13 = vcmp.eq.s32.totalorder %v5499_v7, %v5650_v62 }
  0x25   : > { %4925 = vmatprep.subr.bf16.mxu0 %v5354_v2  ;;  %v549_v43 = vand.u32 4294901760, %v548_v34  ;;  %v556_v44 = vand.u32 4294901760, %v555_v35  ;;  %v575_v45 = vand.u32 4294901760, %v5598_v37  ;;  %v582_v46 = vand.u32 4294901760, %v5600_v38  ;;  %vm5719_vm4 = vmpackc.low %vm992_vm13, %vm991_vm12 }
  0x26   : > { %v4929_v47 = vpack.c.bf16 %v5600_v38, %v5598_v37  ;;  %v563_v50 = vand.u32 4294901760, %v562_v41  ;;  %v570_v52 = vand.u32 4294901760, %v569_v42  ;;  %v5640_v56 = vsub.f32 %v3986_v49, %v3986_v49 }
  0x27   : > { %4912 = vmatpush3.bf16.msk.msra.mxu1 %vm5594_vm10, %v5357_v19  ;;  %v4914_v51 = vpack.c.bf16 %v556_v44, %v549_v43  ;;  %v576_v53 = vsub.f32 %v5598_v37, %v575_v45  ;;  %v583_v54 = vsub.f32 %v5600_v38, %v582_v46  ;;  %v4009_v14 = vsel %vm991_vm12, 1.0, %v5356_v4 }
  0x28   : > { %4927 = vmatpush3.bf16.msra.mxu0 %v4926_v39  ;;  %4364 = vmatprep.subr.mxu1 %v5356_v4  ;;  %v589_v58 = vand.u32 4294901760, %v5640_v56  ;;  %v4917_v59 = vpack.c.bf16 %v570_v52, %v563_v50  ;;  %v4010_v15 = vsel %vm992_vm13, 1.0, %v5356_v4  ;;  %v5677_v17 = vand.u32 4294901760, %v1014_v63 }
  0x29   : > { %4928 = vmatprep.subr.bf16.mxu0 %v5354_v2  ;;  %v577_v60 = vand.u32 4294901760, %v576_v53  ;;  %v584_v61 = vand.u32 4294901760, %v583_v54  ;;  %vm993_vm14 = vcmp.eq.s32.totalorder %v5502_v8, %v5650_v62  ;;  %vm994_vm15 = vcmp.eq.s32.totalorder %v5505_v9, %v5650_v62 }
  0x2a   : > { %v590_v5 = vsub.f32 %v5640_v56, %v589_v58  ;;  %v5685_v18 = vsub.f32 %v4009_v14, %v4009_v14  ;;  %v5687_v31 = vsub.f32 %v4010_v15, %v4010_v15  ;;  %v4011_v32 = vsel %vm993_vm14, 1.0, %v5356_v4  ;;  %vm5765_vm8 = vmpackc.low %vm994_vm15, %vm993_vm14 }
  0x2b   : > { %4365 = vmatpush3.msk.msra.mxu1 %vm442_vm11, %v5358_v55  ;;  %v4920_v1 = vpack.c.bf16 %v584_v61, %v577_v60  ;;  %v4012_v33 = vsel %vm994_vm15, 1.0, %v5356_v4  ;;  %v5703_v35 = vsub.f32 %v1014_v63, %v5677_v17  ;;  %v5705_v39 = vsub.f32 %v4011_v32, %v4011_v32  ;;  %v5820_v61 = vld [vmem:[%s5510_s22 + $0x3] ss:$0 sm:$0xff] }
  0x2c   : > { %4930 = vmatpush3.bf16.msra.mxu0 %v4929_v47  ;;  %4913 = vmatprep.subr.bf16.mxu1 %v5354_v2  ;;  %v591_v34 = vand.u32 4294901760, %v590_v5  ;;  %v5707_v40 = vsub.f32 %v4012_v33, %v4012_v33  ;;  %vm995_vm2 = vcmp.eq.s32.totalorder %v5516_v11, %v5650_v62  ;;  %vm996_vm3 = vcmp.eq.s32.totalorder %v5519_v12, %v5650_v62 }
  0x2d   : > { %4367 = vmatmul.mubr.f32.vlgmr.msra.gmra.mrb[0].mxu1 %v538_v48  ;;  %4398 = vmatprep.subr.mxu0 %v5356_v4  ;;  %v4013_v42 = vsel %vm995_vm2, 1.0, %v5356_v4  ;;  %v4014_v43 = vsel %vm996_vm3, 1.0, %v5356_v4  ;;  %v1101_v44 = vand.u32 4294901760, %v5685_v18  ;;  %v1108_v47 = vand.u32 4294901760, %v5687_v31  ;;  %vm5810_vm9 = vmpackc.low %vm996_vm3, %vm995_vm2 }
  0x2e   : > { %4915 = vmatpush3.bf16.msra.mxu1 %v4914_v51  ;;  %4383 = vmatprep.mubr.msk.f32.mxu1 %vm5355_vm1, %v5356_v4  ;;  %v4941_v48 = vpack.c.bf16 %v554_v28, %v547_v27  ;;  %vm997_vm5 = vcmp.eq.s32.totalorder %v5561_v25, %v5650_v62  ;;  %v6668_v49 = vand.u32 4294901760, %v5703_v35  ;;  %v5749_v50 = vsub.f32 %v4013_v42, %v4013_v42 }
  0x2f   : > { %4916 = vmatprep.subr.bf16.mxu1 %v5354_v2  ;;  %v5751_v51 = vsub.f32 %v4014_v43, %v4014_v43  ;;  %v4015_v20 = vsel %vm997_vm5, 1.0, %v5356_v4  ;;  %v6667_v21 = vand.u32 4294901760, %v5705_v39  ;;  %v1102_v28 = vsub.f32 %v5685_v18, %v1101_v44 }
  0x30   : > { %4399 = vmatpush3.msra.mxu0 %v5640_v56  ;;  %v1109_v52 = vsub.f32 %v5687_v31, %v1108_v47  ;;  %v6666_v53 = vand.u32 4294901760, %v5707_v40  ;;  %v4944_v54 = vpack.c.bf16 %v568_v30, %v561_v29  ;;  %v5789_v57 = vsub.f32 %v4015_v20, %v4015_v20 }
  0x31   : > { %4931 = vmatprep.subr.bf16.mxu0 %v5354_v2  ;;  %4401 = vmatmul.mubr.f32.vlgmr.msra.gmra.mrb[0].mxu0 %v5522_v13  ;;  %v1116_v13 = vsub.f32 %v5705_v39, %v6667_v21  ;;  %v6665_v22 = vand.u32 4294901760, %v5749_v50  ;;  %v6664_v23 = vand.u32 4294901760, %v5751_v51  ;;  %v1103_v29 = vand.u32 4294901760, %v1102_v28 }
  0x32   : > { %4918 = vmatpush3.bf16.msra.mxu1 %v4917_v59  ;;  %4933 = vmatpush3.bf16.msk.msra.mxu0 %vm5534_vm6, %v5357_v19  ;;  %v1091_v59 = vsub.f32 %v5703_v35, %v6668_v49  ;;  %v1110_v30 = vand.u32 4294901760, %v1109_v52  ;;  %v1123_v60 = vsub.f32 %v5707_v40, %v6666_v53  ;;  %v4947_v63 = vpack.c.bf16 %v582_v46, %v575_v45 }
  0x33   : > { %4919 = vmatprep.subr.bf16.mxu1 %v5354_v2  ;;  %4934 = vmatprep.subr.bf16.mxu0 %v5354_v2  ;;  %v1117_v14 = vand.u32 4294901760, %v1116_v13  ;;  %v1130_v15 = vsub.f32 %v5749_v50, %v6665_v22  ;;  %v1137_v37 = vsub.f32 %v5751_v51, %v6664_v23  ;;  %vm2099_vm12 = vcmp.eq.s32.totalorder %v5488_v3, %v5820_v61 }
  0x34   : > { %4417 = vmatprep.mubr.msk.f32.mxu0 %vm5355_vm1, %v5356_v4  ;;  %v1092_v5 = vand.u32 4294901760, %v1091_v59  ;;  %v4968_v38 = vpack.c.bf16 %v1110_v30, %v1103_v29  ;;  %v1124_v45 = vand.u32 4294901760, %v1123_v60  ;;  %vm2100_vm13 = vcmp.eq.s32.totalorder %v5499_v7, %v5820_v61  ;;  %v1566_v60 = vld [vmem:[%s6651_s2 + $0x10] sm:$0xff] }
  0x35   : > { %v4067_v46 = vsel %vm2099_vm12, 1.0, %v5356_v4  ;;  %v4068_v32 = vsel %vm2100_vm13, 1.0, %v5356_v4  ;;  %vm5844_vm14 = vmpackc.low %vm2100_vm13, %vm2099_vm12  ;;  %vm2101_vm15 = vcmp.eq.s32.totalorder %v5502_v8, %v5820_v61  ;;  %vm2102_vm2 = vcmp.eq.s32.totalorder %v5505_v9, %v5820_v61 }
  0x36   : > { %4921 = vmatpush3.bf16.msra.mxu1 %v4920_v1  ;;  %4936 = vmatpush3.bf16.msk.msra.mxu0 %vm5552_vm7, %v5357_v19  ;;  %v6663_v1 = vand.u32 4294901760, %v5789_v57  ;;  %v5857_v42 = vsub.f32 %v4067_v46, %v4067_v46  ;;  %v4069_v43 = vsel %vm2101_vm15, 1.0, %v5356_v4  ;;  %vm5861_vm3 = vmpackc.low %vm2102_vm2, %vm2101_vm15  ;;  %v1131_v28 = vand.u32 4294901760, %v1130_v15 }
  0x37   : > { %4381 = vmatprep.subr.mxu1 %v5356_v4  ;;  %4937 = vmatprep.subr.bf16.mxu0 %v5354_v2  ;;  %v1138_v52 = vand.u32 4294901760, %v1137_v37  ;;  %v5871_v59 = vsub.f32 %v4069_v43, %v4069_v43  ;;  %vm2103_vm12 = vcmp.eq.s32.totalorder %v5516_v11, %v5820_v61  ;;  %vm2104_vm13 = vcmp.eq.s32.totalorder %v5519_v12, %v5820_v61 }
  0x38   : > { %v2209_v29 = vand.u32 4294901760, %v5857_v42  ;;  %v4971_v30 = vpack.c.bf16 %v1124_v45, %v1117_v14  ;;  %vm5887_vm15 = vmpackc.low %vm2104_vm13, %vm2103_vm12  ;;  %v1568_v43 = vsel %vm6669_vm0, %v1566_v60, 0  ;;  %v4983_v10 = vpack.c.bf16 %v5751_v51, %v5749_v50 }
  0x39   : > { %v2223_v46 = vand.u32 4294901760, %v5871_v59  ;;  %v4974_v56 = vpack.c.bf16 %v1138_v52, %v1131_v28 }
  0x3a   : > { %4382 = vmatpush3.msra.mxu1 %v591_v34  ;;  %4939 = vmatpush3.bf16.msk.msra.mxu0 %vm5594_vm10, %v5357_v19  ;;  %v5855_v34 = vsub.f32 %v5789_v57, %v6663_v1 }
  0x3b   : > { %4384 = vmatmul.mubr.f32.vlgmr.msra.gmra.mrb[0].mxu1 %v5495_v6  ;;  %4958 = vmatprep.subr.bf16.mxu1 %v5354_v2  ;;  %v2224_v1 = vsub.f32 %v5871_v59, %v2223_v46 }
  0x3c   : > { %4960 = vmatpush3.bf16.msk.msra.mxu1 %vm5719_vm4, %v5357_v19  ;;  %4415 = vmatprep.subr.mxu0 %v5356_v4  ;;  %v1145_v60 = vand.u32 4294901760, %v5855_v34 }
  0x3d   : > { %4961 = vmatprep.subr.bf16.mxu1 %v5354_v2  ;;  %4468 = vmatprep.mubr.msk.f32.mxu1 %vm5355_vm1, %v5356_v4  ;;  %v2225_v52 = vand.u32 4294901760, %v2224_v1 }
  0x3e   : > { %4416 = vmatpush3.msk.msra.mxu0 %vm442_vm11, %v5358_v55 }
  0x3f   : > { %4940 = vmatprep.subr.bf16.mxu0 %v5354_v2  ;;  %4418 = vmatmul.mubr.f32.vlgmr.msra.gmra.mrb[0].mxu0 %v536_v26 }
  0x40   : > { %4942 = vmatpush3.bf16.msra.mxu0 %v4941_v48  ;;  %4963 = vmatpush3.bf16.msk.msra.mxu1 %vm5765_vm8, %v5357_v19  ;;  %v4070_v48 = vsel %vm2102_vm2, 1.0, %v5356_v4 }
  0x41   : > { %4943 = vmatprep.subr.bf16.mxu0 %v5354_v2  ;;  %4964 = vmatprep.subr.bf16.mxu1 %v5354_v2  ;;  %v5874_v13 = vsub.f32 %v4070_v48, %v4070_v48 }
  0x42   : > { %4434 = vmatprep.mubr.msk.f32.mxu0 %vm5355_vm1, %v5356_v4 }
  0x43   : > { %v2230_v48 = vand.u32 4294901760, %v5874_v13 }
  0x44   : > { %4945 = vmatpush3.bf16.msra.mxu0 %v4944_v54  ;;  %4966 = vmatpush3.bf16.msk.msra.mxu1 %vm5810_vm9, %v5357_v19  ;;  %v5869_v54 = vsub.f32 %v4068_v32, %v4068_v32  ;;  %v5908_v32 = vld [vmem:[%s5510_s22 + $0x2] ss:$0 sm:$0xff]  ;;  %s5290_s22 = scalar_lea.vmem %s6609_s19, 16 }
  0x45   : > { %4946 = vmatprep.subr.bf16.mxu0 %v5354_v2  ;;  %4466 = vmatprep.subr.mxu1 %v5356_v4  ;;  %v2231_v23 = vsub.f32 %v5874_v13, %v2230_v48  ;;  %vm1550_vm0 = vcmp.eq.s32.totalorder %v5519_v12, %v5908_v32  ;;  %p5291_p11 = scmp.ne.s32.totalorder %s6609_s19, %s5290_s22 }
  0x46   : > { %v2216_v45 = vand.u32 4294901760, %v5869_v54 }
  0x47   : > { %p5292_p12 = pnand %p5291_p11, %p5468_p5 }
  0x48   : > { %4948 = vmatpush3.bf16.msra.mxu0 %v4947_v63  ;;  %4467 = vmatpush3.msk.msra.mxu1 %vm997_vm5, %v5358_v55  ;;  %v4071_v63 = vsel %vm2103_vm12, 1.0, %v5356_v4  ;;  %v2217_v0 = vsub.f32 %v5869_v54, %v2216_v45  ;;  %vm1546_vm12 = vcmp.eq.s32.totalorder %v5499_v7, %v5908_v32 }
  0x49   : > { %4967 = vmatprep.subr.bf16.mxu1 %v5354_v2  ;;  %4469 = vmatmul.mubr.f32.vlgmr.msra.gmra.mrb[2].mxu1 %v1092_v5  ;;  %v4072_v5 = vsel %vm2104_vm13, 1.0, %v5356_v4  ;;  %v5896_v14 = vsub.f32 %v4071_v63, %v4071_v63  ;;  %v4039_v24 = vsel %vm1546_vm12, 1.0, %v5356_v4  ;;  %vm1548_vm13 = vcmp.eq.s32.totalorder %v5505_v9, %v5908_v32  ;;  %p5293_p13 = pneg %p5292_p12 }
  0x4a   : > { %4969 = vmatpush3.bf16.msra.mxu1 %v4968_v38  ;;  %4432 = vmatprep.subr.mxu0 %v5356_v4  ;;  %v5898_v37 = vsub.f32 %v4072_v5, %v4072_v5  ;;  %v2210_v38 = vsub.f32 %v5857_v42, %v2209_v29  ;;  %v2218_v28 = vand.u32 4294901760, %v2217_v0  ;;  %v4041_v36 = vsel %vm1548_vm13, 1.0, %v5356_v4 }
  0x4b   : > { %4970 = vmatprep.subr.bf16.mxu1 %v5354_v2  ;;  %4485 = vmatprep.mubr.msk.f32.mxu1 %vm5355_vm1, %v5356_v4  ;;  %v2237_v63 = vand.u32 4294901760, %v5896_v14  ;;  %v6020_v7 = vsub.f32 %v4041_v36, %v4041_v36 }
  0x4c   : > { %4433 = vmatpush3.msra.mxu0 %v589_v58  ;;  %v2244_v5 = vand.u32 4294901760, %v5898_v37  ;;  %v2211_v58 = vand.u32 4294901760, %v2210_v38 }
  0x4d   : > { %4949 = vmatprep.subr.bf16.mxu0 %v5354_v2  ;;  %4435 = vmatmul.mubr.f32.vlgmr.msra.gmra.mrb[0].mxu0 %v5495_v6  ;;  %v2238_v22 = vsub.f32 %v5896_v14, %v2237_v63 }
  0x4e   : > { %4951 = vmatpush3.bf16.msk.msra.mxu0 %vm5534_vm6, %v5357_v19  ;;  %4972 = vmatpush3.bf16.msra.mxu1 %v4971_v30  ;;  %v2245_v16 = vsub.f32 %v5898_v37, %v2244_v5  ;;  %vm1545_vm6 = vcmp.eq.s32.totalorder %v5488_v3, %v5908_v32  ;;  %v2232_v30 = vand.u32 4294901760, %v2231_v23  ;;  %v5940_v49 = vpack.c.bf16 %v2218_v28, %v2211_v58 }
  0x4f   : > { %4952 = vmatprep.subr.bf16.mxu0 %v5354_v2  ;;  %4973 = vmatprep.subr.bf16.mxu1 %v5354_v2  ;;  %v2239_v38 = vand.u32 4294901760, %v2238_v22  ;;  %v4038_v21 = vsel %vm1545_vm6, 1.0, %v5356_v4  ;;  %v4977_v58 = vpack.c.bf16 %v5687_v31, %v5685_v18  ;;  %v5962_v28 = vpack.c.bf16 %v2244_v5, %v2237_v63  ;;  %vm5999_vm2 = vmpackc.low %vm1546_vm12, %vm1545_vm6 }
  0x50   : > { %4451 = vmatprep.mubr.msk.f32.mxu0 %vm5355_vm1, %v5356_v4  ;;  %v2246_v34 = vand.u32 4294901760, %v2245_v16  ;;  %v5952_v23 = vpack.c.bf16 %v2232_v30, %v2225_v52  ;;  %v5960_v16 = vpack.c.bf16 %v2230_v48, %v2223_v46  ;;  %v5966_v22 = vand.u32 4294901760, %v1568_v43 }
  0x51   : > { %v5971_v52 = vsub.f32 %v4038_v21, %v4038_v21  ;;  %v4980_v21 = vpack.c.bf16 %v5707_v40, %v5705_v39  ;;  %vm1551_vm6 = vcmp.eq.s32.totalorder %v5561_v25, %v5908_v32  ;;  %v6704_v18 = vand.u32 4294901760, %v5705_v39 }
  0x52   : > { %4954 = vmatpush3.bf16.msk.msra.mxu0 %vm5552_vm7, %v5357_v19  ;;  %4975 = vmatpush3.bf16.msra.mxu1 %v4974_v56  ;;  %v5954_v1 = vpack.c.bf16 %v2246_v34, %v2239_v38  ;;  %v5956_v56 = vpack.c.bf16 %v2216_v45, %v2209_v29  ;;  %vm1547_vm7 = vcmp.eq.s32.totalorder %v5502_v8, %v5908_v32  ;;  %v6705_v31 = vand.u32 4294901760, %v5707_v40 }
  0x53   : > { %4955 = vmatprep.subr.bf16.mxu0 %v5354_v2  ;;  %4483 = vmatprep.subr.mxu1 %v5356_v4  ;;  %v5973_v29 = vsub.f32 %v4039_v24, %v4039_v24  ;;  %v4040_v45 = vsel %vm1547_vm7, 1.0, %v5356_v4  ;;  %v6014_v5 = vsub.f32 %v1568_v43, %v5966_v22  ;;  %v6674_v30 = vand.u32 4294901760, %v5971_v52 }
  0x54   : > { %v6003_v48 = vsub.f32 %v4040_v45, %v4040_v45  ;;  %v6671_v45 = vand.u32 4294901760, %v6020_v7  ;;  %v6707_v39 = vand.u32 4294901760, %v5751_v51  ;;  %v2120_v51 = vld [vmem:[%s6651_s2 + $0x18] sm:$0xff]  ;;  %v6710_v26 = vand.u32 4294901760, %v5971_v52 }
  0x55   : > { %v6673_v38 = vand.u32 4294901760, %v5973_v29  ;;  %v6672_v24 = vand.u32 4294901760, %v6014_v5  ;;  %v1656_v8 = vsub.f32 %v5971_v52, %v6674_v30 }
  0x56   : > { %4957 = vmatpush3.bf16.msk.msra.mxu0 %vm5594_vm10, %v5357_v19  ;;  %4484 = vmatpush3.msra.mxu1 %v1145_v60  ;;  %vm1549_vm10 = vcmp.eq.s32.totalorder %v5516_v11, %v5908_v32  ;;  %v4043_v60 = vsel %vm1550_vm0, 1.0, %v5356_v4  ;;  %v1677_v53 = vsub.f32 %v6020_v7, %v6671_v45 }
  0x57   : > { %4976 = vmatprep.subr.bf16.mxu1 %v5354_v2  ;;  %4486 = vmatmul.mubr.f32.vlgmr.msra.gmra.mrb[2].mxu1 %v5677_v17  ;;  %v4042_v63 = vsel %vm1549_vm10, 1.0, %v5356_v4  ;;  %v6049_v34 = vsub.f32 %v4043_v60, %v4043_v60  ;;  %v1663_v9 = vsub.f32 %v5973_v29, %v6673_v38  ;;  %vm6075_vm12 = vmpackc.low %vm1550_vm0, %vm1549_vm10  ;;  %vm6709_vm0 = vcmask 457728  }
  0x58   : > { %4978 = vmatpush3.bf16.msra.mxu1 %v4977_v58  ;;  %4449 = vmatprep.subr.mxu0 %v5356_v4  ;;  %v6047_v43 = vsub.f32 %v4042_v63, %v4042_v63  ;;  %v6670_v58 = vand.u32 4294901760, %v6003_v48  ;;  %v1645_v63 = vsub.f32 %v6014_v5, %v6672_v24  ;;  %v1678_v38 = vand.u32 4294901760, %v1677_v53 }
  0x59   : > { %4979 = vmatprep.subr.bf16.mxu1 %v5354_v2  ;;  %4502 = vmatprep.mubr.msk.f32.mxu1 %vm5355_vm1, %v5356_v4  ;;  %v1690_v11 = vand.u32 4294901760, %v6049_v34  ;;  %v1664_v0 = vand.u32 4294901760, %v1663_v9  ;;  %v2122_v41 = vsel %vm6709_vm0, %v2120_v51, 0  ;;  %v3827_v51 = vld [vmem:[%s6658_s9 + $0x18] sm:$0xff] }
  0x5a   : > { %4450 = vmatpush3.msk.msra.mxu0 %vm442_vm11, %v5358_v55  ;;  %vm6043_vm11 = vmpackc.low %vm1548_vm13, %vm1547_vm7  ;;  %v1683_v60 = vand.u32 4294901760, %v6047_v43  ;;  %v1670_v12 = vsub.f32 %v6003_v48, %v6670_v58  ;;  %v1646_v9 = vand.u32 4294901760, %v1645_v63 }
  0x5b   : > { %4452 = vmatmul.mubr.f32.vlgmr.msra.gmra.mrb[0].mxu0 %v5495_v6  ;;  %5012 = vmatprep.subr.bf16.mxu0 %v5354_v2  ;;  %v1691_v30 = vsub.f32 %v6049_v34, %v1690_v11 }
  0x5c   : > { %4981 = vmatpush3.bf16.msra.mxu1 %v4980_v21  ;;  %5014 = vmatpush3.bf16.msk.msra.mxu0 %vm5999_vm2, %v5357_v19  ;;  %v4044_v21 = vsel %vm1551_vm6, 1.0, %v5356_v4  ;;  %v1684_v58 = vsub.f32 %v6047_v43, %v1683_v60  ;;  %v1671_v24 = vand.u32 4294901760, %v1670_v12  ;;  %v5037_v12 = vpack.c.bf16 %v6049_v34, %v6047_v43 }
  0x5d   : > { %4982 = vmatprep.subr.bf16.mxu1 %v5354_v2  ;;  %5015 = vmatprep.subr.bf16.mxu0 %v5354_v2 }
  0x5e   : > { %4570 = vmatprep.mubr.msk.f32.mxu0 %vm5355_vm1, %v5356_v4  ;;  %v5025_v53 = vpack.c.bf16 %v1678_v38, %v1671_v24 }
  0x60   : > { %4984 = vmatpush3.bf16.msra.mxu1 %v4983_v10  ;;  %5017 = vmatpush3.bf16.msk.msra.mxu0 %vm6043_vm11, %v5357_v19  ;;  %v1657_v10 = vand.u32 4294901760, %v1656_v8  ;;  %v6100_v8 = vsub.f32 %v4044_v21, %v4044_v21  ;;  %v1692_v21 = vand.u32 4294901760, %v1691_v30  ;;  %v4995_v30 = vpack.c.bf16 %v1108_v47, %v1101_v44 }
  0x61   : > { %4500 = vmatprep.subr.mxu1 %v5356_v4  ;;  %5018 = vmatprep.subr.bf16.mxu0 %v5354_v2  ;;  %v4998_v44 = vpack.c.bf16 %v6705_v31, %v6704_v18  ;;  %v5031_v47 = vpack.c.bf16 %v5973_v29, %v5971_v52  ;;  %v6713_v52 = vand.u32 4294901760, %v6003_v48  ;;  %v3258_v18 = vld [vmem:[%s6655_s6 + $0x10] sm:$0xff]  ;;  %v3259_v31 = vld [vmem:[%s6655_s6 + $0x18] sm:$0xff] }
  0x62   : > { %v5022_v45 = vpack.c.bf16 %v1664_v0, %v1657_v10  ;;  %v1685_v0 = vand.u32 4294901760, %v1684_v58  ;;  %v1697_v63 = vand.u32 4294901760, %v6100_v8  ;;  %v6703_v58 = vand.u32 4294901760, %v5703_v35 }
  0x64   : > { %4501 = vmatpush3.msra.mxu1 %v5789_v57  ;;  %5020 = vmatpush3.bf16.msk.msra.mxu0 %vm6075_vm12, %v5357_v19  ;;  %v5028_v10 = vpack.c.bf16 %v1692_v21, %v1685_v0  ;;  %v1698_v38 = vsub.f32 %v6100_v8, %v1697_v63 }
  0x65   : > { %4985 = vmatprep.subr.bf16.mxu1 %v5354_v2  ;;  %4503 = vmatmul.mubr.f32.vlgmr.msra.gmra.mrb[2].mxu1 %v5703_v35  ;;  %v6706_v35 = vand.u32 4294901760, %v5749_v50  ;;  %v6708_v50 = vand.u32 4294901760, %v5789_v57  ;;  %v6201_v57 = vand.u32 4294901760, %v2122_v41 }
  0x66   : > { %4987 = vmatpush3.bf16.msk.msra.mxu1 %vm5719_vm4, %v5357_v19  ;;  %4568 = vmatprep.subr.mxu0 %v5356_v4  ;;  %v1699_v24 = vand.u32 4294901760, %v1698_v38 }
  0x67   : > { %4988 = vmatprep.subr.bf16.mxu1 %v5354_v2  ;;  %4519 = vmatprep.mubr.msk.f32.mxu1 %vm5355_vm1, %v5356_v4  ;;  %v5001_v40 = vpack.c.bf16 %v6707_v39, %v6706_v35  ;;  %v6212_v27 = vsub.f32 %v2122_v41, %v6201_v57  ;;  %v5360_v35 = vmov 1   ;;  %v3290_v39 = vld [vmem:[%s6654_s5 + $0x10] sm:$0xff]  ;;  %v2648_v41 = vld [vmem:[%s6652_s3] sm:$0xff] }
  0x68   : > { %4569 = vmatpush3.msk.msra.mxu0 %vm1551_vm6, %v5358_v55 }
  0x69   : > { %5021 = vmatprep.subr.bf16.mxu0 %v5354_v2  ;;  %4571 = vmatmul.mubr.f32.vlgmr.msra.gmra.mrb[2].mxu0 %v1646_v9  ;;  %v6711_v9 = vand.u32 4294901760, %v5973_v29  ;;  %v6714_v29 = vand.u32 4294901760, %v6020_v7 }
  0x6a   : > { %4990 = vmatpush3.bf16.msk.msra.mxu1 %vm5765_vm8, %v5357_v19  ;;  %5023 = vmatpush3.bf16.msra.mxu0 %v5022_v45  ;;  %v5034_v45 = vpack.c.bf16 %v6020_v7, %v6003_v48  ;;  %v5055_v48 = vpack.c.bf16 %v1690_v11, %v1683_v60 }
  0x6b   : > { %4991 = vmatprep.subr.bf16.mxu1 %v5354_v2  ;;  %5024 = vmatprep.subr.bf16.mxu0 %v5354_v2  ;;  %v5049_v62 = vpack.c.bf16 %v6711_v9, %v6710_v26  ;;  %v5052_v0 = vpack.c.bf16 %v6714_v29, %v6713_v52  ;;  %v2649_v26 = vld [vmem:[%s6652_s3 + $0x8] sm:$0xff] }
  0x6c   : > { %4587 = vmatprep.mubr.msk.f32.mxu0 %vm5355_vm1, %v5356_v4 }
  0x6e   : > { %4993 = vmatpush3.bf16.msk.msra.mxu1 %vm5810_vm9, %v5357_v19  ;;  %5026 = vmatpush3.bf16.msra.mxu0 %v5025_v53  ;;  %v6712_v53 = vand.u32 4294901760, %v6014_v5 }
  0x6f   : > { %4517 = vmatprep.subr.mxu1 %v5356_v4  ;;  %5027 = vmatprep.subr.bf16.mxu0 %v5354_v2 }
  0x72   : > { %4518 = vmatpush3.msk.msra.mxu1 %vm997_vm5, %v5358_v55  ;;  %5029 = vmatpush3.bf16.msra.mxu0 %v5028_v10 }
  0x73   : > { %4994 = vmatprep.subr.bf16.mxu1 %v5354_v2  ;;  %4520 = vmatmul.mubr.f32.vlgmr.msra.gmra.mrb[2].mxu1 %v6703_v58  ;;  %v3257_v58 = vld [vmem:[%s6655_s6 + $0x8] sm:$0xff] }
  0x74   : > { %4996 = vmatpush3.bf16.msra.mxu1 %v4995_v30  ;;  %4585 = vmatprep.subr.mxu0 %v5356_v4  ;;  %v5359_v30 = vmov 0  }
  0x75   : > { %4997 = vmatprep.subr.bf16.mxu1 %v5354_v2  ;;  %4536 = vmatprep.mubr.msk.f32.mxu1 %vm5355_vm1, %v5356_v4 }
  0x76   : > { %4586 = vmatpush3.msra.mxu0 %v1699_v24  ;;  %5280 = vset.pattern.permute.xlu0 %v5359_v30  ;;  %v3233_v24 = vld [vmem:[%s6653_s4 + $0x8] sm:$0xff] }
  0x77   : > { %5030 = vmatprep.subr.bf16.mxu0 %v5354_v2  ;;  %4588 = vmatmul.mubr.f32.vlgmr.msra.gmra.mrb[2].mxu0 %v5966_v22 }
  0x78   : > { %4999 = vmatpush3.bf16.msra.mxu1 %v4998_v44  ;;  %5032 = vmatpush3.bf16.msra.mxu0 %v5031_v47  ;;  %v3289_v44 = vld [vmem:[%s6654_s5 + $0x8] sm:$0xff]  ;;  %v3288_v47 = vld [vmem:[%s6654_s5] sm:$0xff] }
  0x79   : > { %5000 = vmatprep.subr.bf16.mxu1 %v5354_v2  ;;  %5033 = vmatprep.subr.bf16.mxu0 %v5354_v2 }
  0x7a   : > { %4604 = vmatprep.mubr.msk.f32.mxu0 %vm5355_vm1, %v5356_v4  ;;  %5281 = vset.pattern.permute.xlu1 %v5359_v30 }
  0x7c   : > { %5002 = vmatpush3.bf16.msra.mxu1 %v5001_v40  ;;  %5035 = vmatpush3.bf16.msra.mxu0 %v5034_v45  ;;  %v3291_v40 = vld [vmem:[%s6654_s5 + $0x18] sm:$0xff]  ;;  %v3824_v45 = vld [vmem:[%s6658_s9] sm:$0xff] }
  0x7d   : > { %4534 = vmatprep.subr.mxu1 %v5356_v4  ;;  %5036 = vmatprep.subr.bf16.mxu0 %v5354_v2 }
  0x80   : > { %4535 = vmatpush3.msra.mxu1 %v6708_v50  ;;  %5038 = vmatpush3.bf16.msra.mxu0 %v5037_v12  ;;  %v3825_v12 = vld [vmem:[%s6658_s9 + $0x8] sm:$0xff]  ;;  %v3354_v50 = vld [vmem:[%s6657_s8] sm:$0xff] }
  0x81   : > { %5003 = vmatprep.subr.bf16.mxu1 %v5354_v2  ;;  %4537 = vmatmul.mubr.f32.vlgmr.msra.gmra.mrb[2].mxu1 %v5677_v17 }
  0x82   : > { %5005 = vmatpush3.bf16.msk.msra.mxu1 %vm5719_vm4, %v5357_v19  ;;  %4602 = vmatprep.subr.mxu0 %v5356_v4  ;;  %vm6715_vm4 = vcmp.eq.s32.totalorder %v5561_v25, %v5820_v61 }
  0x83   : > { %5006 = vmatprep.subr.bf16.mxu1 %v5354_v2  ;;  %4553 = vmatprep.mubr.msk.f32.mxu1 %vm5355_vm1, %v5356_v4 }
  0x84   : > { %4603 = vmatpush3.msra.mxu0 %v6100_v8  ;;  %v3232_v8 = vld [vmem:[%s6653_s4] sm:$0xff] }
  0x85   : > { %5039 = vmatprep.subr.bf16.mxu0 %v5354_v2  ;;  %4605 = vmatmul.mubr.f32.vlgmr.msra.gmra.mrb[2].mxu0 %v6014_v5  ;;  %v4073_v5 = vsel %vm6715_vm4, 1.0, %v5356_v4 }
  0x86   : > { %5008 = vmatpush3.bf16.msk.msra.mxu1 %vm5765_vm8, %v5357_v19  ;;  %5041 = vmatpush3.bf16.msk.msra.mxu0 %vm5999_vm2, %v5357_v19  ;;  %v2250_v10 = vsub.f32 %v4073_v5, %v4073_v5  ;;  %vm6720_vm8 = vmmov %vm6715_vm4 }
  0x87   : > { %5009 = vmatprep.subr.bf16.mxu1 %v5354_v2  ;;  %5042 = vmatprep.subr.bf16.mxu0 %v5354_v2 }
  0x88   : > { %4621 = vmatprep.mubr.msk.f32.mxu0 %vm5355_vm1, %v5356_v4  ;;  %v2251_v43 = vand.u32 4294901760, %v2250_v10  ;;  %3236 = vperm.xlu0 %5280, %v3232_v8  }
  0x8a   : > { %5011 = vmatpush3.bf16.msk.msra.mxu1 %vm5810_vm9, %v5357_v19  ;;  %5044 = vmatpush3.bf16.msk.msra.mxu0 %vm6043_vm11, %v5357_v19  ;;  %vm6721_vm9 = vmmov %vm6715_vm4 }
  0x8b   : > { %4551 = vmatprep.subr.mxu1 %v5356_v4  ;;  %5045 = vmatprep.subr.bf16.mxu0 %v5354_v2 }
  0x8c   : > { %3241 = vperm.xlu0 %5280, %v3233_v24  }
  0x8e   : > { %4552 = vmatpush3.msk.msra.mxu1 %vm997_vm5, %v5358_v55  ;;  %5047 = vmatpush3.bf16.msk.msra.mxu0 %vm6075_vm12, %v5357_v19  ;;  %vm6716_vm5 = vmmov %vm6715_vm4 }
  0x8f   : > { %4554 = vmatmul.mubr.f32.vlgmr.msra.gmra.mrb[2].mxu1 %v5677_v17  ;;  %5066 = vmatprep.subr.bf16.mxu1 %v5354_v2  ;;  %v2198_v17 = vand.u32 4294901760, %v6212_v27 }
  0x90   : > { %5068 = vmatpush3.bf16.msk.msra.mxu1 %vm5844_vm14, %v5357_v19  ;;  %4619 = vmatprep.subr.mxu0 %v5356_v4 }
  0x91   : > { %5069 = vmatprep.subr.bf16.mxu1 %v5354_v2  ;;  %4672 = vmatprep.mubr.msk.f32.mxu1 %vm5355_vm1, %v5356_v4  ;;  %v2199_v21 = vsub.f32 %v6212_v27, %v2198_v17 }
  0x92   : > { %4620 = vmatpush3.msk.msra.mxu0 %vm1551_vm6, %v5358_v55  ;;  %3272 = vperm.xlu0 %5280, %v3258_v18  }
  0x93   : > { %5048 = vmatprep.subr.bf16.mxu0 %v5354_v2  ;;  %4622 = vmatmul.mubr.f32.vlgmr.msra.gmra.mrb[2].mxu0 %v6712_v53  ;;  %v2200_v7 = vand.u32 4294901760, %v2199_v21 }
  0x94   : > { %5050 = vmatpush3.bf16.msra.mxu0 %v5049_v62  ;;  %5071 = vmatpush3.bf16.msk.msra.mxu1 %vm5861_vm3, %v5357_v19 }
  0x95   : > { %5051 = vmatprep.subr.bf16.mxu0 %v5354_v2  ;;  %5072 = vmatprep.subr.bf16.mxu1 %v5354_v2 }
  0x96   : > { %4638 = vmatprep.mubr.msk.f32.mxu0 %vm5355_vm1, %v5356_v4  ;;  %5282 = vset.pattern.permute.xlu0 %v5360_v35 }
  0x97   : > { %3294 = vperm.xlu0 %5282, %v3288_v47  }
  0x98   : > { %5053 = vmatpush3.bf16.msra.mxu0 %v5052_v0  ;;  %5074 = vmatpush3.bf16.msk.msra.mxu1 %vm5887_vm15, %v5357_v19 }
  0x99   : > { %5054 = vmatprep.subr.bf16.mxu0 %v5354_v2  ;;  %4670 = vmatprep.subr.mxu1 %v5356_v4 }
  0x9b   : > { %3309 = vperm.xlu0 %5282, %v3291_v40  }
  0x9c   : > { %5056 = vmatpush3.bf16.msra.mxu0 %v5055_v48  ;;  %4671 = vmatpush3.msk.msra.mxu1 %vm6716_vm5, %v5358_v55 }
  0x9d   : > { %5075 = vmatprep.subr.bf16.mxu1 %v5354_v2  ;;  %4673 = vmatmul.mubr.f32.vlgmr.msra.gmra.mrb[4].mxu1 %v2200_v7 }
  0x9e   : > { %5077 = vmatpush3.bf16.msra.mxu1 %v5940_v49  ;;  %4636 = vmatprep.subr.mxu0 %v5356_v4  ;;  %v2252_v49 = vsub.f32 %v2250_v10, %v2251_v43 }
  0x9f   : > { %5078 = vmatprep.subr.bf16.mxu1 %v5354_v2  ;;  %4689 = vmatprep.mubr.msk.f32.mxu1 %vm5355_vm1, %v5356_v4 }
  0xa0   : > { %4637 = vmatpush3.msra.mxu0 %v1697_v63  ;;  %v2253_v34 = vand.u32 4294901760, %v2252_v49  ;;  %v3256_v63 = vld [vmem:[%s6655_s6] sm:$0xff]  ;;  %3334 = vperm.xlu0 %5282, %v3257_v58  }
  0xa1   : > { %5057 = vmatprep.subr.bf16.mxu0 %v5354_v2  ;;  %4639 = vmatmul.mubr.f32.vlgmr.msra.gmra.mrb[2].mxu0 %v5966_v22 }
  0xa2   : > { %5059 = vmatpush3.bf16.msk.msra.mxu0 %vm5999_vm2, %v5357_v19  ;;  %5080 = vmatpush3.bf16.msra.mxu1 %v5952_v23  ;;  %v6717_v23 = vpack.c.bf16 %v5869_v54, %v5857_v42  ;;  %v6718_v42 = vpack.c.bf16 %v5874_v13, %v5871_v59  ;;  %v6719_v54 = vpack.c.bf16 %v5898_v37, %v5896_v14 }
  0xa3   : > { %5060 = vmatprep.subr.bf16.mxu0 %v5354_v2  ;;  %5081 = vmatprep.subr.bf16.mxu1 %v5354_v2 }
  0xa4   : > { %4655 = vmatprep.mubr.msk.f32.mxu0 %vm5355_vm1, %v5356_v4  ;;  %3262 = vperm.xlu1 %5281, %v3256_v63  }
  0xa5   : > { %3342 = vperm.xlu0 %5282, %v3259_v31  }
  0xa6   : > { %5062 = vmatpush3.bf16.msk.msra.mxu0 %vm6043_vm11, %v5357_v19  ;;  %5083 = vmatpush3.bf16.msra.mxu1 %v5954_v1 }
  0xa7   : > { %5063 = vmatprep.subr.bf16.mxu0 %v5354_v2  ;;  %4687 = vmatprep.subr.mxu1 %v5356_v4 }
  0xa8   : > { %3267 = vperm.xlu1 %5281, %v3257_v58  }
  0xa9   : > { %5285 = vset.pattern.permute.xlu0 %v5359_v30 }
  0xaa   : > { %5065 = vmatpush3.bf16.msk.msra.mxu0 %vm6075_vm12, %v5357_v19  ;;  %4688 = vmatpush3.msra.mxu1 %v2253_v34 }
  0xab   : > { %5084 = vmatprep.subr.bf16.mxu1 %v5354_v2  ;;  %4690 = vmatmul.mubr.f32.vlgmr.msra.gmra.mrb[4].mxu1 %v6201_v57 }
  0xac   : > { %5086 = vmatpush3.bf16.msra.mxu1 %v6717_v23  ;;  %4653 = vmatprep.subr.mxu0 %v5356_v4 }
  0xad   : > { %5087 = vmatprep.subr.bf16.mxu1 %v5354_v2  ;;  %4706 = vmatprep.mubr.msk.f32.mxu1 %vm5355_vm1, %v5356_v4 }
  0xae   : > { %4654 = vmatpush3.msk.msra.mxu0 %vm1551_vm6, %v5358_v55  ;;  %3277 = vperm.xlu1 %5281, %v3259_v31  }
  0xaf   : > { %4656 = vmatmul.mubr.f32.vlgmr.msra.gmra.mrb[2].mxu0 %v5966_v22  ;;  %5120 = vmatprep.subr.bf16.mxu0 %v5354_v2 }
  0xb0   : > { %5089 = vmatpush3.bf16.msra.mxu1 %v6718_v42  ;;  %4768 = vmatprep.mubr.msk.f32.mxu0 %vm5355_vm1, %v5356_v4 }
  0xb1   : > { %5090 = vmatprep.subr.bf16.mxu1 %v5354_v2  ;;  %3835 = vperm.xlu0 %5285, %v3825_v12  }
  0xb2   : > { %5283 = vset.pattern.permute.xlu1 %v5360_v35 }
  0xb3   : > { %3299 = vperm.xlu1 %5283, %v3289_v44  }
  0xb4   : > { %5092 = vmatpush3.bf16.msra.mxu1 %v6719_v54 }
  0xb5   : > { %4704 = vmatprep.subr.mxu1 %v5356_v4  ;;  %3845 = vperm.xlu0 %5285, %v3827_v51  }
  0xb7   : > { %3304 = vperm.xlu1 %5283, %v3290_v39  }
  0xb8   : > { %4705 = vmatpush3.msra.mxu1 %v2250_v10 }
  0xb9   : > { %5093 = vmatprep.subr.bf16.mxu1 %v5354_v2  ;;  %4707 = vmatmul.mubr.f32.vlgmr.msra.gmra.mrb[4].mxu1 %v6212_v27  ;;  %v3826_v27 = vld [vmem:[%s6658_s9 + $0x10] sm:$0xff] }
  0xba   : > { %5095 = vmatpush3.bf16.msk.msra.mxu1 %vm5844_vm14, %v5357_v19  ;;  %4723 = vmatprep.mubr.msk.f32.mxu1 %vm5355_vm1, %v5356_v4 }
  0xbb   : > { %5096 = vmatprep.subr.bf16.mxu1 %v5354_v2  ;;  %3330 = vperm.xlu1 %5283, %v3256_v63  }
  0xbe   : > { %5098 = vmatpush3.bf16.msk.msra.mxu1 %vm5861_vm3, %v5357_v19 }
  0xbf   : > { %5099 = vmatprep.subr.bf16.mxu1 %v5354_v2  ;;  %3338 = vperm.xlu1 %5283, %v3258_v18  }
  0xc2   : > { %5101 = vmatpush3.bf16.msk.msra.mxu1 %vm5887_vm15, %v5357_v19 }
  0xc3   : > { %4721 = vmatprep.subr.mxu1 %v5356_v4  ;;  %5284 = vset.pattern.permute.xlu1 %v5359_v30 }
  0xc4   : > { %3830 = vperm.xlu1 %5284, %v3824_v45  }
  0xc6   : > { %4722 = vmatpush3.msk.msra.mxu1 %vm6720_vm8, %v5358_v55 }
  0xc7   : > { %5102 = vmatprep.subr.bf16.mxu1 %v5354_v2  ;;  %4724 = vmatmul.mubr.f32.vlgmr.msra.gmra.mrb[4].mxu1 %v2198_v17  ;;  %v2650_v17 = vld [vmem:[%s6652_s3 + $0x10] sm:$0x1] }
  0xc8   : > { %5104 = vmatpush3.bf16.msra.mxu1 %v5956_v56  ;;  %4740 = vmatprep.mubr.msk.f32.mxu1 %vm5355_vm1, %v5356_v4 }
  0xc9   : > { %5105 = vmatprep.subr.bf16.mxu1 %v5354_v2  ;;  %3357 = vperm.xlu1 %5284, %v3354_v50  }
  0xcc   : > { %5107 = vmatpush3.bf16.msra.mxu1 %v5960_v16 }
  0xcd   : > { %5108 = vmatprep.subr.bf16.mxu1 %v5354_v2  ;;  %3840 = vperm.xlu1 %5284, %v3826_v27  }
  0xd0   : > { %5110 = vmatpush3.bf16.msra.mxu1 %v5962_v28 }
  0xd1   : > { %4738 = vmatprep.subr.mxu1 %v5356_v4 }
  0xd4   : > { %4739 = vmatpush3.msra.mxu1 %v2251_v43 }
  0xd5   : > { %5111 = vmatprep.subr.bf16.mxu1 %v5354_v2  ;;  %4741 = vmatmul.mubr.f32.vlgmr.msra.gmra.mrb[4].mxu1 %v6201_v57 }
  0xd6   : > { %5113 = vmatpush3.bf16.msk.msra.mxu1 %vm5844_vm14, %v5357_v19  ;;  %4757 = vmatprep.mubr.msk.f32.mxu1 %vm5355_vm1, %v5356_v4  ;;  %vm2651_vm14 = vcmask 261120  }
  0xd7   : > { %5114 = vmatprep.subr.bf16.mxu1 %v5354_v2  ;;  %v2656_v62 = vsel %vm2651_vm14, %v2649_v26, 0  ;;  %v2659_v0 = vsel %vm2651_vm14, %v2650_v17, 0 }
  0xd8   : > { %v6467_v52 = vand.u32 4294901760, %v2656_v62  ;;  %v6472_v48 = vand.u32 4294901760, %v2659_v0 }
  0xda   : > { %5116 = vmatpush3.bf16.msk.msra.mxu1 %vm5861_vm3, %v5357_v19  ;;  %v2741_v5 = vsub.f32 %v2656_v62, %v6467_v52  ;;  %v2751_v34 = vsub.f32 %v2659_v0, %v6472_v48  ;;  %vm3360_vm3 = vcmask 130048  }
  0xdb   : > { %5117 = vmatprep.subr.bf16.mxu1 %v5354_v2 }
  0xdc   : > { %v2742_v49 = vand.u32 4294901760, %v2741_v5 }
  0xde   : > { %5119 = vmatpush3.bf16.msk.msra.mxu1 %vm5887_vm15, %v5357_v19 }
  0xdf   : > { %4755 = vmatprep.subr.mxu1 %v5356_v4 }
  0xe2   : > { %4756 = vmatpush3.msk.msra.mxu1 %vm6721_vm9, %v5358_v55 }
  0xe3   : > { %4758 = vmatmul.mubr.f32.vlgmr.msra.gmra.mrb[4].mxu1 %v6201_v57  ;;  %5156 = vmatprep.subr.bf16.mxu1 %v5354_v2  ;;  %v2653_v57 = vsel %vm2651_vm14, %v2648_v41, 0 }
  0xe4   : > { %4866 = vmatprep.mubr.msk.f32.mxu1 %vm5355_vm1, %v5356_v4  ;;  %v6459_v9 = vand.u32 4294901760, %v2653_v57 }
  0xe6   : > { %v6465_v53 = vsub.f32 %v2653_v57, %v6459_v9 }
  0xe8   : > { %v2732_v21 = vand.u32 4294901760, %v6465_v53 }
  0xea   : > { %v2733_v43 = vsub.f32 %v6465_v53, %v2732_v21 }
 0x10e   : > { %v646_v33 = vpop.f32.mrb[0].mxu1 }
 0x10f   : > { %v4385_v20 = vpop.f32.mrb[1].mxu1 }
 0x123   : > { %v3263_v17 = vpop.permute.xlu1 %3262 }
 0x12e   : > { %v982_v59 = vpop.f32.mrb[0].mxu0 }
 0x12f   : > { %v6380_v13 = vadd.f32 %v982_v59, %v646_v33  ;;  %v4453_v19 = vpop.f32.mrb[1].mxu0  ;;  %v2734_v59 = vand.u32 4294901760, %v2733_v43 }
 0x130   : > { %v2743_v19 = vsub.f32 %v2741_v5, %v2742_v49 }
 0x131   : > { %v2662_v15 = vand.u32 4294901760, %v6380_v13 }
 0x133   : > { %v6384_v14 = vsub.f32 %v6380_v13, %v2662_v15 }
 0x135   : > { %v2763_v37 = vand.u32 4294901760, %v6384_v14 }
 0x137   : > { %v2764_v1 = vsub.f32 %v6384_v14, %v2763_v37 }
 0x139   : > { %v2765_v6 = vand.u32 4294901760, %v2764_v1 }
 0x162   : > { %v6386_v25 = vpop.f32.mrb[2].mxu1 }
 0x163   : > { %v2665_v55 = vand.u32 4294901760, %v6386_v25  ;;  %v4555_v61 = vpop.f32.mrb[3].mxu1 }
 0x165   : > { %v6391_v32 = vsub.f32 %v6386_v25, %v2665_v55  ;;  %v6393_v22 = vpack.c.bf16 %v2665_v55, %v2662_v15  ;;  %v2752_v15 = vand.u32 4294901760, %v2751_v34 }
 0x167   : > { %5122 = vmatpush3.bf16.msra.mxu0 %v6393_v22  ;;  %v2770_v56 = vand.u32 4294901760, %v6391_v32  ;;  %v5133_v16 = vpack.c.bf16 %v6391_v32, %v6384_v14  ;;  %v3861_v14 = vld [vmem:[%s6659_s10] sm:$0xff] }
 0x168   : > { %5123 = vmatprep.subr.bf16.mxu0 %v5354_v2  ;;  %3864 = vperm.xlu1 %5284, %v3861_v14  }
 0x169   : > { %v2771_v28 = vsub.f32 %v6391_v32, %v2770_v56  ;;  %v6402_v46 = vpack.c.bf16 %v2770_v56, %v2763_v37 }
 0x16b   : > { %v2772_v36 = vand.u32 4294901760, %v2771_v28  ;;  %v2744_v28 = vand.u32 4294901760, %v2743_v19 }
 0x16d   : > { %v6404_v60 = vpack.c.bf16 %v2772_v36, %v2765_v6  ;;  %v2753_v6 = vsub.f32 %v2751_v34, %v2752_v15 }
 0x182   : > { %v6406_v11 = vpop.f32.mrb[2].mxu0 }
 0x183   : > { %v4657_v38 = vpop.f32.mrb[3].mxu0  ;;  %v2668_v29 = vand.u32 4294901760, %v6406_v11 }
 0x184   : > { %v2754_v38 = vand.u32 4294901760, %v2753_v6 }
 0x185   : > { %v2776_v7 = vsub.f32 %v6406_v11, %v2668_v29 }
 0x187   : > { %v2777_v54 = vand.u32 4294901760, %v2776_v7 }
 0x189   : > { %v2778_v55 = vsub.f32 %v2776_v7, %v2777_v54 }
 0x18b   : > { %v2779_v36 = vand.u32 4294901760, %v2778_v55  ;;  %v3250_v55 = vsub.s32 0, %v5488_v3 }
 0x1b6   : > { %v6475_v10 = vpop.f32.mrb[4].mxu1 }
 0x1b7   : > { %v2671_v23 = vand.u32 4294901760, %v6475_v10  ;;  %v4759_v42 = vpop.f32.mrb[5].mxu1 }
 0x1b9   : > { %v2783_v33 = vsub.f32 %v6475_v10, %v2671_v23  ;;  %v5124_v20 = vpack.c.bf16 %v2671_v23, %v2668_v29 }
 0x1bb   : > { %5125 = vmatpush3.bf16.msra.mxu0 %v5124_v20  ;;  %v2784_v61 = vand.u32 4294901760, %v2783_v33  ;;  %v5136_v37 = vpack.c.bf16 %v2783_v33, %v2776_v7 }
 0x1bc   : > { %5126 = vmatprep.subr.bf16.mxu0 %v5354_v2 }
 0x1bd   : > { %v2785_v1 = vsub.f32 %v2783_v33, %v2784_v61  ;;  %v5148_v56 = vpack.c.bf16 %v2784_v61, %v2777_v54 }
 0x1be   : > { %4769 = vmatmul.mubr.f32.vlgmr.msra.gmra.mrb[4].mxu0 %v2734_v59 }
 0x1bf   : > { %5128 = vmatpush3.bf16.msra.mxu0 %v6404_v60  ;;  %4771 = vmatprep.mubr.msk.f32.mxu0 %vm5355_vm1, %v5356_v4  ;;  %v2786_v8 = vand.u32 4294901760, %v2785_v1 }
 0x1c0   : > { %5129 = vmatprep.subr.bf16.mxu0 %v5354_v2 }
 0x1c1   : > { %v5130_v63 = vpack.c.bf16 %v2786_v8, %v2779_v36 }
 0x1c2   : > { %4772 = vmatmul.mubr.f32.gmra.mrb[6].mxu0 %v2744_v28 }
 0x1c3   : > { %5131 = vmatpush3.bf16.msra.mxu0 %v5130_v63  ;;  %4774 = vmatprep.mubr.msk.f32.mxu0 %vm5355_vm1, %v5356_v4 }
 0x1c4   : > { %5132 = vmatprep.subr.bf16.mxu0 %v5354_v2 }
 0x1c6   : > { %4775 = vmatmul.mubr.f32.gmra.mrb[8].mxu0 %v2754_v38 }
 0x1c7   : > { %4785 = vmatprep.mubr.msk.f32.mxu0 %vm5355_vm1, %v5356_v4 }
 0x1ca   : > { %4786 = vmatmul.mubr.f32.vlgmr.msra.gmra.mrb[10].mxu0 %v6459_v9 }
 0x1cb   : > { %5134 = vmatpush3.bf16.msra.mxu0 %v5133_v16  ;;  %4788 = vmatprep.mubr.msk.f32.mxu0 %vm5355_vm1, %v5356_v4 }
 0x1cc   : > { %5135 = vmatprep.subr.bf16.mxu0 %v5354_v2 }
 0x1ce   : > { %4789 = vmatmul.mubr.f32.gmra.mrb[12].mxu0 %v6467_v52 }
 0x1cf   : > { %5137 = vmatpush3.bf16.msra.mxu0 %v5136_v37  ;;  %4791 = vmatprep.mubr.msk.f32.mxu0 %vm5355_vm1, %v5356_v4 }
 0x1d0   : > { %5138 = vmatprep.subr.bf16.mxu0 %v5354_v2 }
 0x1d2   : > { %4792 = vmatmul.mubr.f32.gmra.mrb[8].mxu0 %v6472_v48 }
 0x1d3   : > { %4802 = vmatprep.mubr.msk.f32.mxu0 %vm5355_vm1, %v5356_v4 }
 0x1d6   : > { %4803 = vmatmul.mubr.f32.vlgmr.msra.gmra.mrb[14].mxu0 %v6465_v53 }
 0x1d7   : > { %5140 = vmatpush3.bf16.msra.mxu0 %v6393_v22  ;;  %4805 = vmatprep.mubr.msk.f32.mxu0 %vm5355_vm1, %v5356_v4 }
 0x1d8   : > { %5141 = vmatprep.subr.bf16.mxu0 %v5354_v2 }
 0x1da   : > { %4806 = vmatmul.mubr.f32.gmra.mrb[16].mxu0 %v2741_v5  ;;  %v3237_v5 = vpop.permute.xlu0 %3236 }
 0x1db   : > { %5143 = vmatpush3.bf16.msra.mxu0 %v5124_v20  ;;  %4808 = vmatprep.mubr.msk.f32.mxu0 %vm5355_vm1, %v5356_v4 }
 0x1dc   : > { %5144 = vmatprep.subr.bf16.mxu0 %v5354_v2 }
 0x1de   : > { %4809 = vmatmul.mubr.f32.gmra.mrb[8].mxu0 %v2751_v34  ;;  %v3242_v23 = vpop.permute.xlu0 %3241 }
 0x1df   : > { %4819 = vmatprep.mubr.msk.f32.mxu0 %vm5355_vm1, %v5356_v4 }
 0x1e2   : > { %4820 = vmatmul.mubr.f32.vlgmr.msra.gmra.mrb[18].mxu0 %v2732_v21 }
 0x1e3   : > { %5146 = vmatpush3.bf16.msra.mxu0 %v6402_v46  ;;  %4822 = vmatprep.mubr.msk.f32.mxu0 %vm5355_vm1, %v5356_v4 }
 0x1e4   : > { %5147 = vmatprep.subr.bf16.mxu0 %v5354_v2 }
 0x1e6   : > { %4823 = vmatmul.mubr.f32.gmra.mrb[20].mxu0 %v2742_v49 }
 0x1e7   : > { %5149 = vmatpush3.bf16.msra.mxu0 %v5148_v56  ;;  %4825 = vmatprep.mubr.msk.f32.mxu0 %vm5355_vm1, %v5356_v4  ;;  %v3273_v56 = vpop.permute.xlu0 %3272 }
 0x1e8   : > { %5150 = vmatprep.subr.bf16.mxu0 %v5354_v2 }
 0x1ea   : > { %4826 = vmatmul.mubr.f32.gmra.mrb[8].mxu0 %v2752_v15 }
 0x1eb   : > { %4836 = vmatprep.mubr.msk.f32.mxu0 %vm5355_vm1, %v5356_v4 }
 0x1ee   : > { %4837 = vmatmul.mubr.f32.vlgmr.msra.gmra.mrb[22].mxu0 %v6459_v9 }
 0x1ef   : > { %5152 = vmatpush3.bf16.msra.mxu0 %v6393_v22  ;;  %4839 = vmatprep.mubr.msk.f32.mxu0 %vm5355_vm1, %v5356_v4 }
 0x1f0   : > { %5153 = vmatprep.subr.bf16.mxu0 %v5354_v2 }
 0x1f2   : > { %4840 = vmatmul.mubr.f32.gmra.mrb[24].mxu0 %v6467_v52 }
 0x1f3   : > { %5155 = vmatpush3.bf16.msra.mxu0 %v5124_v20  ;;  %4842 = vmatprep.mubr.msk.f32.mxu0 %vm5355_vm1, %v5356_v4 }
 0x1f6   : > { %4843 = vmatmul.mubr.f32.gmra.mrb[8].mxu0 %v6472_v48 }
 0x1f7   : > { %4853 = vmatprep.mubr.msk.f32.mxu0 %vm5355_vm1, %v5356_v4 }
 0x1fa   : > { %4854 = vmatmul.mubr.f32.vlgmr.msra.gmra.mrb[26].mxu0 %v6459_v9 }
 0x1fb   : > { %4856 = vmatprep.mubr.msk.f32.mxu0 %vm5355_vm1, %v5356_v4 }
 0x1fe   : > { %4857 = vmatmul.mubr.f32.gmra.mrb[28].mxu0 %v6467_v52  ;;  %v3353_v52 = vld [vmem:[%s6656_s7] sm:$0xff] }
 0x1ff   : > { %4859 = vmatprep.mubr.msk.f32.mxu0 %vm5355_vm1, %v5356_v4  ;;  %v3362_v21 = vsel %vm3360_vm3, %v3353_v52, 0 }
 0x200   : > { %v6548_v7 = vand.u32 4294901760, %v3362_v21 }
 0x202   : > { %4860 = vmatmul.mubr.f32.gmra.mrb[8].mxu0 %v6472_v48  ;;  %v3268_v48 = vpop.permute.xlu1 %3267  ;;  %v6551_v42 = vsub.f32 %v3362_v21, %v6548_v7 }
 0x204   : > { %v3433_v61 = vand.u32 4294901760, %v6551_v42 }
 0x206   : > { %v3278_v33 = vpop.permute.xlu1 %3277  ;;  %v3434_v14 = vsub.f32 %v6551_v42, %v3433_v61 }
 0x20a   : > { %v3300_v38 = vpop.permute.xlu1 %3299 }
 0x291   : > { %v2736_v32 = vpop.f32.mrb[4].mxu0 }
 0x292   : > { %v4770_v22 = vpop.f32.mrb[5].mxu0 }
 0x295   : > { %v2746_v16 = vpop.f32.mrb[6].mxu0 }
 0x296   : > { %v4773_v46 = vpop.f32.mrb[7].mxu0 }
 0x29d   : > { %v2847_v60 = vpop.f32.mrb[10].mxu0 }
 0x29e   : > { %v2848_v30 = vadd.f32 %v2847_v60, %v2736_v32  ;;  %v4787_v24 = vpop.f32.mrb[11].mxu0 }
 0x2a1   : > { %v2853_v58 = vpop.f32.mrb[12].mxu0 }
 0x2a2   : > { %v2854_v18 = vadd.f32 %v2853_v58, %v2746_v16  ;;  %v4790_v31 = vpop.f32.mrb[13].mxu0 }
 0x2a9   : > { %v2939_v44 = vpop.f32.mrb[14].mxu0 }
 0x2aa   : > { %v2940_v47 = vadd.f32 %v2939_v44, %v2848_v30  ;;  %v4804_v35 = vpop.f32.mrb[15].mxu0 }
 0x2ab   : > { %v3435_v35 = vand.u32 4294901760, %v3434_v14 }
 0x2ad   : > { %v2946_v39 = vpop.f32.mrb[16].mxu0 }
 0x2ae   : > { %v2947_v40 = vadd.f32 %v2946_v39, %v2854_v18  ;;  %v4807_v45 = vpop.f32.mrb[17].mxu0  ;;  %v3295_v18 = vpop.permute.xlu0 %3294 }
 0x2b5   : > { %v3030_v12 = vpop.f32.mrb[18].mxu0 }
 0x2b6   : > { %v3031_v50 = vadd.f32 %v3030_v12, %v2940_v47  ;;  %v4821_v51 = vpop.f32.mrb[19].mxu0  ;;  %v3305_v12 = vpop.permute.xlu1 %3304 }
 0x2b9   : > { %v3038_v41 = vpop.f32.mrb[20].mxu0 }
 0x2ba   : > { %v3039_v57 = vadd.f32 %v3038_v41, %v2947_v40  ;;  %v4824_v27 = vpop.f32.mrb[21].mxu0 }
 0x2c1   : > { %v3129_v26 = vpop.f32.mrb[22].mxu0 }
 0x2c2   : > { %v3130_v9 = vadd.f32 %v3129_v26, %v3031_v50  ;;  %v4838_v62 = vpop.f32.mrb[23].mxu0 }
 0x2c5   : > { %v3135_v53 = vpop.f32.mrb[24].mxu0 }
 0x2c6   : > { %v3136_v29 = vadd.f32 %v3135_v53, %v3039_v57  ;;  %v4841_v0 = vpop.f32.mrb[25].mxu0 }
 0x2cd   : > { %v3216_v43 = vpop.f32.mrb[26].mxu0 }
 0x2ce   : > { %v3217_v49 = vadd.f32 %v3216_v43, %v3130_v9  ;;  %v4855_v34 = vpop.f32.mrb[27].mxu0 }
 0x2d0   : > { %v3244_v54 = vadd.f32 %v3237_v5, %v3217_v49 }
 0x2d1   : > { %v3222_v20 = vpop.f32.mrb[28].mxu0 }
 0x2d2   : > { %v3246_v59 = vmax.f32 %v3244_v54, 0.0  ;;  %v3223_v19 = vadd.f32 %v3222_v20, %v3136_v29  ;;  %v4858_v15 = vpop.f32.mrb[29].mxu0  ;;  %v3331_v29 = vpop.permute.xlu1 %3330 }
 0x2d4   : > { %v3365_v37 = vand.u32 4294901760, %v3246_v59  ;;  %v3245_v1 = vadd.f32 %v3242_v23, %v3223_v19 }
 0x2d5   : > { %v3228_v28 = vpop.f32.mrb[8].mxu0 }
 0x2d6   : > { %v3443_v6 = vsub.f32 %v3246_v59, %v3365_v37  ;;  %v3247_v36 = vmax.f32 %v3245_v1, 0.0  ;;  %v3251_v8 = vrot.slane %v3228_v28, %v3250_v55  ;;  %v4861_v63 = vpop.f32.mrb[9].mxu0  ;;  %v3339_v34 = vpop.permute.xlu1 %3338 }
 0x2d8   : > { %v3444_v32 = vand.u32 4294901760, %v3443_v6  ;;  %v3368_v22 = vand.u32 4294901760, %v3247_v36  ;;  %v3253_v16 = vmul.f32 %v3251_v8, %v6386_v25  ;;  %v3252_v3 = vmul.f32 %v6380_v13, %v3251_v8 }
 0x2d9   : > { %v3254_v46 = vmul.f32 %v3251_v8, %v6406_v11  ;;  %v3255_v60 = vmul.f32 %v3251_v8, %v6475_v10 }
 0x2da   : > { %v6562_v30 = vpack.c.bf16 %v3368_v22, %v3365_v37  ;;  %v3450_v24 = vsub.f32 %v3247_v36, %v3368_v22  ;;  %v3281_v58 = vadd.f32 %v3268_v48, %v3253_v16  ;;  %v3280_v31 = vadd.f32 %v3263_v17, %v3252_v3  ;;  %v3310_v17 = vpop.permute.xlu0 %3309  ;;  %v3831_v59 = vpop.permute.xlu1 %3830 }
 0x2db   : > { %v3282_v44 = vadd.f32 %v3273_v56, %v3254_v46  ;;  %v3283_v47 = vadd.f32 %v3278_v33, %v3255_v60  ;;  %v3445_v39 = vsub.f32 %v3443_v6, %v3444_v32 }
 0x2dc   : > { %v3451_v40 = vand.u32 4294901760, %v3450_v24  ;;  %v3285_v45 = vadd.f32 %v3281_v58, %v6386_v25  ;;  %5158 = vmatpush3.bf16.msra.mxu1 %v6562_v30  ;;  %v5163_v50 = vpack.c.bf16 %v3450_v24, %v3443_v6  ;;  %v3284_v51 = vadd.f32 %v6380_v13, %v3280_v31 }
 0x2dd   : > { %v3286_v41 = vadd.f32 %v3282_v44, %v6406_v11  ;;  %v3287_v57 = vadd.f32 %v3283_v47, %v6475_v10  ;;  %5159 = vmatprep.subr.bf16.mxu1 %v5354_v2  ;;  %v3446_v53 = vand.u32 4294901760, %v3445_v39 }
 0x2de   : > { %v3452_v27 = vsub.f32 %v3450_v24, %v3451_v40  ;;  %v3313_v26 = vmul.f32 %v3300_v38, %v3285_v45  ;;  %v5169_v9 = vpack.c.bf16 %v3451_v40, %v3444_v32  ;;  %v3312_v62 = vmul.f32 %v3295_v18, %v3284_v51  ;;  %v3335_v54 = vpop.permute.xlu0 %3334  ;;  %v3358_v1 = vpop.permute.xlu1 %3357 }
 0x2df   : > { %4867 = vmatmul.mubr.f32.vlgmr.msra.gmra.mrb[6].mxu1 %v3435_v35  ;;  %v3314_v21 = vmul.f32 %v3305_v12, %v3286_v41  ;;  %v3315_v43 = vmul.f32 %v3310_v17, %v3287_v57 }
 0x2e0   : > { %v3453_v52 = vand.u32 4294901760, %v3452_v27  ;;  %4873 = vmatprep.mubr.msk.f32.mxu1 %vm5355_vm1, %v5356_v4  ;;  %v3316_v0 = vadd.f32 %v3313_v26, %v3312_v62  ;;  %v3876_v26 = vstv %s3875_s0 }
 0x2e2   : > { %v5160_v5 = vpack.c.bf16 %v3453_v52, %v3446_v53  ;;  %v3317_v48 = vadd.f32 %v3316_v0, %v3314_v21  ;;  %v3343_v15 = vpop.permute.xlu0 %3342  ;;  %v3841_v60 = vpop.permute.xlu1 %3840  ;;  %v6722_v53 = vlaneseq }
 0x2e4   : > { %5161 = vmatpush3.bf16.msra.mxu1 %v5160_v5  ;;  %v3318_v49 = vadd.f32 %v3317_v48, %v3315_v43  ;;  %v3886_v52 = vand.u32 127, %v6722_v53  ;;  %v3889_v48 = vld [vmem:[%s422_s29] sm:$0x1]  ;;  %s5296_s29 = scalar_lea.vmem %s5295_s27, 32 }
 0x2e5   : > { %5162 = vmatprep.subr.bf16.mxu1 %v5354_v2  ;;  %vm3891_vm15 = vcmp.ge.s32.totalorder %v3889_v48, 0  ;;  %vm3893_vm7 = vcmp.lt.s32.totalorder %v3889_v48, 3  ;;  %p5298_p1 = scmp.lt.s32.totalorder %s5296_s29, %s5290_s22 }
 0x2e6   : > { %v3319_v23 = vrot.slane %v3318_v49, 4  ;;  %v3836_v8 = vpop.permute.xlu0 %3835  ;;  %v3865_v39 = vpop.permute.xlu1 %3864 }
 0x2e7   : > { %4874 = vmatmul.mubr.f32.vlgmr.msra.gmra.mrb[6].mxu1 %v6548_v7  ;;  %p5299_p2 = por %p5298_p1, %p5297_p0 }
 0x2e8   : > { %5164 = vmatpush3.bf16.msra.mxu1 %v5163_v50  ;;  %4880 = vmatprep.mubr.msk.f32.mxu1 %vm5355_vm1, %v5356_v4  ;;  %v3320_v33 = vadd.f32 %v3319_v23, %v3318_v49 }
 0x2e9   : > { %5165 = vmatprep.subr.bf16.mxu1 %v5354_v2  ;;  %p5300_p3 = pnand %p5299_p2, %p5293_p13 }
 0x2ea   : > { %v3321_v20 = vrot.slane %v3320_v33, 2 }
 0x2ec   : > { %v3322_v19 = vadd.f32 %v3321_v20, %v3320_v33 }
 0x2ee   : > { %v3323_v55 = vrot.slane %v3322_v19, 1 }
 0x2ef   : > { %4881 = vmatmul.mubr.f32.vlgmr.msra.gmra.mrb[6].mxu1 %v6551_v42 }
 0x2f0   : > { %5167 = vmatpush3.bf16.msra.mxu1 %v6562_v30  ;;  %4887 = vmatprep.mubr.msk.f32.mxu1 %vm5355_vm1, %v5356_v4  ;;  %v3324_v37 = vadd.f32 %v3323_v55, %v3322_v19 }
 0x2f1   : > { %5168 = vmatprep.subr.bf16.mxu1 %v5354_v2 }
 0x2f2   : > { %v3325_v56 = vmul.f32 %v6380_v13, %v3324_v37  ;;  %v3327_v28 = vmul.f32 %v3324_v37, %v6406_v11  ;;  %v3326_v6 = vmul.f32 %v3324_v37, %v6386_v25  ;;  %v3328_v36 = vmul.f32 %v3324_v37, %v6475_v10  ;;  %v3846_v11 = vpop.permute.xlu0 %3845 }
 0x2f4   : > { %v3345_v63 = vadd.f32 %v3331_v29, %v3325_v56  ;;  %v3347_v38 = vadd.f32 %v3339_v34, %v3327_v28  ;;  %v3346_v14 = vadd.f32 %v3335_v54, %v3326_v6  ;;  %v3348_v32 = vadd.f32 %v3343_v15, %v3328_v36 }
 0x2f5   : > { %v3887_v29 = vstv %s4096_s21  ;;  %s3898_s21 = scalar_lea.sflag [#allocation4], %s414_s30 }
 0x2f6   : > { %v3349_v22 = vadd.f32 %v3345_v63, %v3284_v51  ;;  %v3350_v16 = vadd.f32 %v3346_v14, %v3285_v45  ;;  %v3351_v3 = vadd.f32 %v3347_v38, %v3286_v41  ;;  %v3352_v46 = vadd.f32 %v3348_v32, %v3287_v57 }
 0x2f7   : > { %4888 = vmatmul.mubr.f32.vlgmr.msra.gmra.mrb[6].mxu1 %v3433_v61  ;;  %v3888_v5 = vadd.s32 %v3887_v29, %v3886_v52 }
 0x2f8   : > { %5170 = vmatpush3.bf16.msra.mxu1 %v5169_v9  ;;  %4894 = vmatprep.mubr.msk.f32.mxu1 %vm5355_vm1, %v5356_v4  ;;  %v3848_v13 = vmul.f32 %v3831_v59, %v3349_v22  ;;  %v3849_v25 = vmul.f32 %v3836_v8, %v3350_v16  ;;  %v3850_v24 = vmul.f32 %v3841_v60, %v3351_v3 }
 0x2f9   : > { %5171 = vmatprep.subr.bf16.mxu1 %v5354_v2  ;;  %v3851_v18 = vmul.f32 %v3846_v11, %v3352_v46 }
 0x2fa   : > { %v3852_v10 = vadd.f32 %v3849_v25, %v3848_v13 }
 0x2fc   : > { %v3853_v58 = vadd.f32 %v3852_v10, %v3850_v24 }
 0x2fe   : > { %v3854_v31 = vadd.f32 %v3853_v58, %v3851_v18 }
 0x2ff   : > { %4895 = vmatmul.mubr.f32.vlgmr.msra.gmra.mrb[6].mxu1 %v6548_v7 }
 0x300   : > { %5173 = vmatpush3.bf16.msra.mxu1 %v6562_v30  ;;  %4901 = vmatprep.mubr.msk.f32.mxu1 %vm5355_vm1, %v5356_v4  ;;  %v3855_v42 = vrot.slane %v3854_v31, 4  ;;  %vm3890_vm1 = vcmp.lt.s32.totalorder %v3888_v5, 200 }
 0x301   : > { %vm3892_vm2 = vmand %vm3890_vm1, %vm3891_vm15 }
 0x302   : > { %v3856_v44 = vadd.f32 %v3855_v42, %v3854_v31  ;;  %vm3894_vm13 = vmand %vm3892_vm2, %vm3893_vm7 }
 0x304   : > { %v3857_v40 = vrot.slane %v3856_v44, 2 }
 0x306   : > { %v3858_v50 = vadd.f32 %v3857_v40, %v3856_v44 }
 0x307   : > { %4902 = vmatmul.mubr.f32.vlgmr.msra.gmra.mrb[6].mxu1 %v6548_v7 }
 0x308   : > { %v3859_v41 = vrot.slane %v3858_v50, 1 }
 0x30a   : > { %v3860_v7 = vadd.f32 %v3859_v41, %v3858_v50 }
 0x3da   : > { %v3819_v61 = vpop.f32.mrb[6].mxu1 }
 0x3db   : > { %v5175_v47 = vadd.f32 %v3819_v61, %v3358_v1  ;;  %v4903_v2 = vpop.f32.mrb[7].mxu1 }
 0x3dd   : > { %v3823_v35 = vmax.f32 %v5175_v47, 0.0 }
 0x3df   : > { %v3867_v45 = vmul.f32 %v3865_v39, %v3823_v35 }
 0x3e1   : > { %v3868_v12 = vrot.slane %v3867_v45, 4 }
 0x3e3   : > { %v3869_v51 = vadd.f32 %v3868_v12, %v3867_v45 }
 0x3e5   : > { %v3870_v30 = vrot.slane %v3869_v51, 2 }
 0x3e7   : > { %v3871_v4 = vadd.f32 %v3870_v30, %v3869_v51 }
 0x3e9   : > { %v3872_v57 = vrot.slane %v3871_v4, 1 }
 0x3eb   : > { %v3873_v27 = vadd.f32 %v3872_v57, %v3871_v4 }
 0x3ed   : > { %v3874_v9 = vadd.f32 %v3873_v27, %v3860_v7 }
 0x3ef   : > { %v3877_v62 = vadd.f32 %v3876_v26, %v3874_v9 }
 0x3f1   : > { %v4095_v17 = vmul.f32 -1.442695, %v3877_v62 }
 0x3f3   : > { %5286 = vpow2.f32 %v4095_v17 }
 0x3fd   : > { %v5287_v0 = vpop.eup %5286 }
 0x3fe   : > { %v3881_v21 = vadd.f32 1.0, %v5287_v0 }
 0x400   : > { %5288 = vrcp.f32 %v3881_v21 }
 0x40a   : > { %v5289_v43 = vpop.eup %5288 }
 0x40b   : > { %v3895_v49 = vsel %vm3894_vm13, %v5289_v43, 0.0 }
 0x40c   : > { %3896 = vst [vmem:[%s415_s17] sm:$0x1] %v3895_v49 }
 0x40d   : > { %5303 = shalt.err (!%p5300_p3)
}
 0x40e   : > { %s5304_s30 = scalar_lea.hbm %s6607_s18, 16  ;;  %s5308_s20 = scalar_lea.hbm %s6661_s12, 32 }
 0x40f   : > { %p5305_p4 = scmp.ne.s32.totalorder %s6607_s18, %s5304_s30  ;;  %p5309_p9 = scmp.lt.u32.totalorder %s6607_s18, %s6661_s12 }
 0x410   : > { %p5310_p10 = scmp.lt.u32.totalorder %s5308_s20, %s5304_s30  ;;  %p5312_p12 = scmp.lt.u32.totalorder %s5304_s30, %s6607_s18 }
 0x411   : > { %p5306_p7 = pnand %p5305_p4, %p5468_p5 }
 0x412   : > { %p5311_p11 = por %p5310_p10, %p5309_p9 }
 0x413   : > { %p5307_p8 = pneg %p5306_p7 }
 0x414   : > { %p5313_p13 = por %p5312_p12, %p5311_p11 }
 0x416   : > { %p5314_p0 = pnand %p5313_p13, %p5307_p8 }
 0x418   : > { %5317 = shalt.err (!%p5314_p0)
}
 0x419   : > { %5234 = dma.vmem_to_hbm [thread:$0]  (%p5468_p5), %s6609_s19, 16, %s6607_s18, %s3898_s21  }
 0x41a PF: > { %p5240_p1 = scmp.ge.s32.totalorder %s5352_s26, 2  ;;  %s3922_s22 = sand.u32 1, %s5340_s23  }
 0x41b   : > { %s3923_s27 = scalar_lea.sflag [#allocation4], %s3922_s22 }
 0x41c   : > { %p5237_p2 = pnand %p5240_p1, %p5472_p6 }
 0x41e   : > { %5335 = dma.done.wait (!%p5237_p2), %s3923_s27, 16  }
 0x41f   : > { %5337 = vsyncadd (!%p5237_p2), %s3923_s27, 4294967280  ;;  %p23_p3 = scmp.ge.s32.totalorder %s5455_s28, 4   ;;  %s6723_s23 = smov %s5344_s24 }
 0x420   : > { %s6724_s24 = smov %s5348_s25  ;;  %s6725_s25 = smov %s5466_s13 }
 0x421   : > { %s6726_s26 = smov %s5455_s28  ;;  %25 = sbr.rel (!%p23_p3) target bundleno = 6 (0x6), region = 106 }
 0x428   :  { %3927 = vsyncpa [#allocation4], 1 }
 0x429   :  { %3929 = vsyncpa [#allocation4 + $0x1], 1 }

</bundles_post_ra>
